<compile_context>
chip_gen: v7x
topology: tpu7x:2x2x1
jax: 0.10.0
libtpu: 0.0.40
codegen_flags: <defaults>
</compile_context>

<pallas_src>
import jax
import jax.numpy as jnp
from jax.experimental import pallas as pl
from jax.experimental.pallas import tpu as pltpu


LANE = 128                     # TPU lane width (last-dim native extent)
DEFAULT_TILE_B = 8192          # batch rows per grid step (multiple of 8)
MIN_PALLAS_BATCH = 512         # below this, plain XLA is cheaper than a custom call
VMEM_LIMIT_BYTES = 48 * 1024 * 1024


def _round_up(x, m):
    return ((x + m - 1) // m) * m


def _cdiv(a, b):
    return (a + b - 1) // b


# --------------------------------------------------------------------------
# Kernel: one batch tile through the whole MLP (weights resident in VMEM).
# --------------------------------------------------------------------------
def investment_nn_kernel(x_ref, w1_ref, b1_ref, w2_ref, b2_ref, w3_ref, b3_ref,
                         out_ref):
    # x tile arrives as f32 from HBM; cast to bf16 on the VPU (free under DMA).
    x = x_ref[...].astype(jnp.bfloat16)

    # Layer 1: Linear(F -> H1p) + bias + ReLU, fused downcast to bf16.
    # (Dropout = identity in eval mode.)
    h1 = jnp.maximum(
        jnp.dot(x, w1_ref[...], preferred_element_type=jnp.float32) + b1_ref[...],
        0.0).astype(jnp.bfloat16)

    # Layer 2: Linear(H1p -> H2p) + bias + ReLU, fused downcast to bf16.
    h2 = jnp.maximum(
        jnp.dot(h1, w2_ref[...], preferred_element_type=jnp.float32) + b2_ref[...],
        0.0).astype(jnp.bfloat16)

    # Output layer: Linear(H2p -> O) + bias, logits (no activation), f32 out.
    out = jnp.dot(h2, w3_ref[...], preferred_element_type=jnp.float32) + b3_ref[...]
    out_ref[...] = out.astype(out_ref.dtype)


# --------------------------------------------------------------------------
# One-time weight packing (do NOT call per forward).
# --------------------------------------------------------------------------
def pack_params(params):
    """Pad hidden widths to 128 lanes (exact, zero-padded) and cast weights to
    bf16 once. Returns a dict holding both packed tensors (Pallas path) and the
    original f32 tensors (small-batch XLA fast path)."""
    w1, b1, w2, b2, w3, b3 = (params["w1"], params["b1"], params["w2"],
                              params["b2"], params["w3"], params["b3"])
    F, H1 = w1.shape
    H2, O = w2.shape[1], w3.shape[1]
    H1p, H2p = _round_up(H1, LANE), _round_up(H2, LANE)

    packed = {
        "w1p": jnp.pad(w1, ((0, 0), (0, H1p - H1))).astype(jnp.bfloat16),
        "b1p": jnp.pad(b1, ((0, 0), (0, H1p - H1))),                      # f32
        "w2p": jnp.pad(w2, ((0, H1p - H1), (0, H2p - H2))).astype(jnp.bfloat16),
        "b2p": jnp.pad(b2, ((0, 0), (0, H2p - H2))),                      # f32
        "w3p": jnp.pad(w3, ((0, H2p - H2), (0, 0))).astype(jnp.bfloat16),
        "b3":  b3,                                                        # f32
        # originals for the small-batch fast path
        "w1": w1, "b1": b1, "w2": w2, "b2": b2, "w3": w3,
        "dims": (F, H1, H2, O, H1p, H2p),
    }
    return packed


# --------------------------------------------------------------------------
# Forward
# --------------------------------------------------------------------------
def investment_nn_forward(x, packed, tile_b=DEFAULT_TILE_B,
                          min_pallas_batch=MIN_PALLAS_BATCH):
    """x: [B, input_size] float32; packed: result of pack_params()."""
    B = x.shape[0]
    F, H1, H2, O, H1p, H2p = packed["dims"]
    assert x.shape[1] == F

    # Small-batch fast path: one custom-call's fixed overhead exceeds the
    # whole XLA dot chain here.
    if B < min_pallas_batch:
        h1 = jnp.maximum(x @ packed["w1"] + packed["b1"], 0.0)
        h2 = jnp.maximum(h1 @ packed["w2"] + packed["b2"], 0.0)
        return h2 @ packed["w3"] + packed["b3"]

    w1p, b1p, w2p, b2p, w3p, b3 = (packed["w1p"], packed["b1p"], packed["w2p"],
                                   packed["b2p"], packed["w3p"], packed["b3"])

    # Tile selection: big tiles (few steps, step-overhead bound), but ensure
    # >= 2 grid steps when B allows so both v7x TensorCores get work.
    two_step = _round_up(_cdiv(B, 2), 8)
    tile_b = max(8, min(tile_b, two_step))
    grid = (_cdiv(B, tile_b),)          # ragged last block handled by Pallas

    cost = pl.CostEstimate(
        flops=2 * B * (F * H1p + H1p * H2p + H2p * O),
        transcendentals=0,
        bytes_accessed=(B * F * 4                                   # x (f32 in)
                        + B * O * 4                                 # output
                        + (w1p.size + w2p.size + w3p.size) * 2      # bf16 weights
                        + (b1p.size + b2p.size + b3.size) * 4))     # f32 biases

    return pl.pallas_call(
        investment_nn_kernel,
        out_shape=jax.ShapeDtypeStruct((B, O), jnp.float32),
        grid=grid,
        in_specs=[
            pl.BlockSpec((tile_b, F), lambda i: (i, 0)),   # streamed x tile (f32)
            pl.BlockSpec((F, H1p),    lambda i: (0, 0)),   # resident weights
            pl.BlockSpec((1, H1p),    lambda i: (0, 0)),
            pl.BlockSpec((H1p, H2p),  lambda i: (0, 0)),
            pl.BlockSpec((1, H2p),    lambda i: (0, 0)),
            pl.BlockSpec((H2p, O),    lambda i: (0, 0)),
            pl.BlockSpec((1, O),      lambda i: (0, 0)),
        ],
        out_specs=pl.BlockSpec((tile_b, O), lambda i: (i, 0)),
        compiler_params=pltpu.CompilerParams(
            dimension_semantics=("parallel",),
            vmem_limit_bytes=VMEM_LIMIT_BYTES),
        cost_estimate=cost,
    )(x, w1p, b1p, w2p, b2p, w3p, b3)


# --------------------------------------------------------------------------
# Init + references
# --------------------------------------------------------------------------
def init_params(key, input_size, hidden_sizes=(32, 16), output_size=2):
    """Deterministic init mimicking PyTorch Linear default (uniform +-1/sqrt(fan_in))."""
    sizes = [input_size] + list(hidden_sizes) + [output_size]
    params = {}
    for i in range(len(sizes) - 1):
        fan_in, fan_out = sizes[i], sizes[i + 1]
        key, kw, kb = jax.random.split(key, 3)
        bound = 1.0 / (fan_in ** 0.5)
        params[f"w{i+1}"] = jax.random.uniform(
            kw, (fan_in, fan_out), jnp.float32, minval=-bound, maxval=bound)
        params[f"b{i+1}"] = jax.random.uniform(
            kb, (1, fan_out), jnp.float32, minval=-bound, maxval=bound)
    return params


def reference_forward_f32(x, params):
    h1 = jnp.maximum(x @ params["w1"] + params["b1"], 0.0)
    h2 = jnp.maximum(h1 @ params["w2"] + params["b2"], 0.0)
    return h2 @ params["w3"] + params["b3"]


def reference_forward_bf16(x, params):
    """Same bf16-operand / f32-accumulate / bf16-intermediate math as the kernel."""
    bf = jnp.bfloat16
    h1 = jnp.maximum(
        jnp.dot(x.astype(bf), params["w1"].astype(bf),
                preferred_element_type=jnp.float32) + params["b1"], 0.0).astype(bf)
    h2 = jnp.maximum(
        jnp.dot(h1, params["w2"].astype(bf),
                preferred_element_type=jnp.float32) + params["b2"], 0.0).astype(bf)
    return jnp.dot(h2, params["w3"].astype(bf),
                   preferred_element_type=jnp.float32) + params["b3"]


if __name__ == "__main__":
    key = jax.random.PRNGKey(0)
    input_size, hidden_sizes, output_size = 16, (32, 16), 2

    key, kx = jax.random.split(key)
    params = init_params(key, input_size, hidden_sizes, output_size)
    packed = pack_params(params)        # one-time packing (cached by caller)

    # --- Pallas path: B above the small-batch cutoff and ragged vs. the tile.
    batch = 1000
    x = jax.random.normal(kx, (batch, input_size), jnp.float32)
    out = jax.block_until_ready(investment_nn_forward(x, packed))

    ref_bf16 = reference_forward_bf16(x, params)   # numerically matched reference
    ref_f32 = reference_forward_f32(x, params)     # semantic (PyTorch f32) reference

    assert out.shape == (batch, output_size)
    assert jnp.allclose(out, ref_bf16, atol=2e-3, rtol=2e-3), "mismatch vs bf16 reference"
    assert jnp.allclose(out, ref_f32, atol=1e-1, rtol=1e-1), "mismatch vs f32 reference"

    # --- Small-batch fast path (plain XLA, exact f32).
    x_small = x[:8]
    out_small = jax.block_until_ready(investment_nn_forward(x_small, packed))
    assert out_small.shape == (8, output_size)
    assert jnp.allclose(out_small, ref_f32[:8], atol=1e-5, rtol=1e-5), "fast path mismatch"

    print("KERNEL_OK")
</pallas_src>

<mosaic_0001>
module attributes {stable_mosaic.version = 11 : i64} {
  func.func @investment_nn_kernel(%arg0: i32, %arg1: memref<504x16xf32, #tpu.memory_space<vmem>>, %arg2: memref<16x128xbf16, #tpu.memory_space<vmem>>, %arg3: memref<1x128xf32, #tpu.memory_space<vmem>>, %arg4: memref<128x128xbf16, #tpu.memory_space<vmem>>, %arg5: memref<1x128xf32, #tpu.memory_space<vmem>>, %arg6: memref<128x2xbf16, #tpu.memory_space<vmem>>, %arg7: memref<1x2xf32, #tpu.memory_space<vmem>>, %arg8: memref<504x2xf32, #tpu.memory_space<vmem>>) attributes {dimension_semantics = [#tpu.dimension_semantics<parallel>], iteration_bounds = array<i64: 2>, scalar_prefetch = 0 : i64, scratch_operands = 0 : i64, tpu.core_type = #tpu.core_type<tc>, window_params = [{transform_indices = @transform_0, window_bounds = array<i64: 504, 16>}, {pipeline_mode = #tpu.pipeline_mode<synchronous>, transform_indices = @transform_1, window_bounds = array<i64: 16, 128>}, {pipeline_mode = #tpu.pipeline_mode<synchronous>, transform_indices = @transform_2, window_bounds = array<i64: 1, 128>}, {pipeline_mode = #tpu.pipeline_mode<synchronous>, transform_indices = @transform_3, window_bounds = array<i64: 128, 128>}, {pipeline_mode = #tpu.pipeline_mode<synchronous>, transform_indices = @transform_4, window_bounds = array<i64: 1, 128>}, {pipeline_mode = #tpu.pipeline_mode<synchronous>, transform_indices = @transform_5, window_bounds = array<i64: 128, 2>}, {pipeline_mode = #tpu.pipeline_mode<synchronous>, transform_indices = @transform_6, window_bounds = array<i64: 1, 2>}, {transform_indices = @transform_7, window_bounds = array<i64: 504, 2>}]} {
    %c0 = arith.constant 0 : index
    %c0_0 = arith.constant 0 : index
    %0 = vector.load %arg1[%c0, %c0_0] : memref<504x16xf32, #tpu.memory_space<vmem>>, vector<504x16xf32>
    %1 = arith.truncf %0 : vector<504x16xf32> to vector<504x16xbf16>
    %c0_1 = arith.constant 0 : index
    %c0_2 = arith.constant 0 : index
    %2 = vector.load %arg2[%c0_1, %c0_2] : memref<16x128xbf16, #tpu.memory_space<vmem>>, vector<16x128xbf16>
    %cst = arith.constant dense<0.000000e+00> : vector<504x128xf32>
    %3 = tpu.matmul %1, %2, %cst {dimension_numbers = #tpu.dot_dimension_numbers<[1], [0], [0], [1], [0, 0, 1, 1], [], []>} : vector<504x16xbf16>, vector<16x128xbf16>, vector<504x128xf32> -> vector<504x128xf32>
    %c0_3 = arith.constant 0 : index
    %c0_4 = arith.constant 0 : index
    %4 = vector.load %arg3[%c0_3, %c0_4] : memref<1x128xf32, #tpu.memory_space<vmem>>, vector<1x128xf32>
    %5 = vector.broadcast %4 : vector<1x128xf32> to vector<504x128xf32>
    %6 = arith.addf %3, %5 : vector<504x128xf32>
    %cst_5 = arith.constant 0.000000e+00 : f32
    %7 = vector.broadcast %cst_5 : f32 to vector<504x128xf32>
    %8 = arith.maximumf %6, %7 : vector<504x128xf32>
    %9 = arith.truncf %8 : vector<504x128xf32> to vector<504x128xbf16>
    %c0_6 = arith.constant 0 : index
    %c0_7 = arith.constant 0 : index
    %10 = vector.load %arg4[%c0_6, %c0_7] : memref<128x128xbf16, #tpu.memory_space<vmem>>, vector<128x128xbf16>
    %cst_8 = arith.constant dense<0.000000e+00> : vector<504x128xf32>
    %11 = tpu.matmul %9, %10, %cst_8 {dimension_numbers = #tpu.dot_dimension_numbers<[1], [0], [0], [1], [0, 0, 1, 1], [], []>} : vector<504x128xbf16>, vector<128x128xbf16>, vector<504x128xf32> -> vector<504x128xf32>
    %c0_9 = arith.constant 0 : index
    %c0_10 = arith.constant 0 : index
    %12 = vector.load %arg5[%c0_9, %c0_10] : memref<1x128xf32, #tpu.memory_space<vmem>>, vector<1x128xf32>
    %13 = vector.broadcast %12 : vector<1x128xf32> to vector<504x128xf32>
    %14 = arith.addf %11, %13 : vector<504x128xf32>
    %cst_11 = arith.constant 0.000000e+00 : f32
    %15 = vector.broadcast %cst_11 : f32 to vector<504x128xf32>
    %16 = arith.maximumf %14, %15 : vector<504x128xf32>
    %17 = arith.truncf %16 : vector<504x128xf32> to vector<504x128xbf16>
    %c0_12 = arith.constant 0 : index
    %c0_13 = arith.constant 0 : index
    %18 = vector.load %arg6[%c0_12, %c0_13] : memref<128x2xbf16, #tpu.memory_space<vmem>>, vector<128x2xbf16>
    %cst_14 = arith.constant dense<0.000000e+00> : vector<504x2xf32>
    %19 = tpu.matmul %17, %18, %cst_14 {dimension_numbers = #tpu.dot_dimension_numbers<[1], [0], [0], [1], [0, 0, 1, 1], [], []>} : vector<504x128xbf16>, vector<128x2xbf16>, vector<504x2xf32> -> vector<504x2xf32>
    %c0_15 = arith.constant 0 : index
    %c0_16 = arith.constant 0 : index
    %20 = vector.load %arg7[%c0_15, %c0_16] : memref<1x2xf32, #tpu.memory_space<vmem>>, vector<1x2xf32>
    %21 = vector.broadcast %20 : vector<1x2xf32> to vector<504x2xf32>
    %22 = arith.addf %19, %21 : vector<504x2xf32>
    %c0_17 = arith.constant 0 : index
    %c0_18 = arith.constant 0 : index
    %23 = vector.load %arg8[%c0_17, %c0_18] : memref<504x2xf32, #tpu.memory_space<vmem>>, vector<504x2xf32>
    tpu.vector_store %arg8[%c0_17, %c0_18], %22 {strides = array<i32>} : memref<504x2xf32, #tpu.memory_space<vmem>>, vector<504x2xf32>,
    return
  }
  func.func @transform_0(%arg0: i32) -> (i32, i32) {
    %c0_i32 = arith.constant 0 : i32
    %c0_i32_0 = arith.constant 0 : i32
    return %arg0, %c0_i32 : i32, i32
  }
  func.func @transform_1(%arg0: i32) -> (i32, i32) {
    %c0_i32 = arith.constant 0 : i32
    %c0_i32_0 = arith.constant 0 : i32
    %c0_i32_1 = arith.constant 0 : i32
    return %c0_i32, %c0_i32_0 : i32, i32
  }
  func.func @transform_2(%arg0: i32) -> (i32, i32) {
    %c0_i32 = arith.constant 0 : i32
    %c0_i32_0 = arith.constant 0 : i32
    %c0_i32_1 = arith.constant 0 : i32
    return %c0_i32, %c0_i32_0 : i32, i32
  }
  func.func @transform_3(%arg0: i32) -> (i32, i32) {
    %c0_i32 = arith.constant 0 : i32
    %c0_i32_0 = arith.constant 0 : i32
    %c0_i32_1 = arith.constant 0 : i32
    return %c0_i32, %c0_i32_0 : i32, i32
  }
  func.func @transform_4(%arg0: i32) -> (i32, i32) {
    %c0_i32 = arith.constant 0 : i32
    %c0_i32_0 = arith.constant 0 : i32
    %c0_i32_1 = arith.constant 0 : i32
    return %c0_i32, %c0_i32_0 : i32, i32
  }
  func.func @transform_5(%arg0: i32) -> (i32, i32) {
    %c0_i32 = arith.constant 0 : i32
    %c0_i32_0 = arith.constant 0 : i32
    %c0_i32_1 = arith.constant 0 : i32
    return %c0_i32, %c0_i32_0 : i32, i32
  }
  func.func @transform_6(%arg0: i32) -> (i32, i32) {
    %c0_i32 = arith.constant 0 : i32
    %c0_i32_0 = arith.constant 0 : i32
    %c0_i32_1 = arith.constant 0 : i32
    return %c0_i32, %c0_i32_0 : i32, i32
  }
  func.func @transform_7(%arg0: i32) -> (i32, i32) {
    %c0_i32 = arith.constant 0 : i32
    %c0_i32_0 = arith.constant 0 : i32
    return %arg0, %c0_i32 : i32, i32
  }
}

</mosaic_0001>

<bundles_post_ra>
// kernel: tpu_custom_call.1
= control target key start
LH: loop header
LB: loop body
LE: loop exit
PB: predicated region body
PF: predicated region fallthrough
CT: control target
= control target key end

     0   :  { %s2883_s24 = smov 0   ;;  %s2885_s25 = smov 0   ;;  %s3630_s0 = inlined_call_operand.vmem [shape: f32[1000,16], index: 0, kind: input, shape index: {}]   ;;  %s3631_s1 = inlined_call_operand.vmem [shape: bf16[16,128], index: 1, kind: input, shape index: {}]   ;;  %s3632_s2 = inlined_call_operand.vmem [shape: f32[1,128], index: 2, kind: input, shape index: {}]   ;;  %s3633_s3 = inlined_call_operand.vmem [shape: bf16[128,128], index: 3, kind: input, shape index: {}]   ;;  %s3634_s4 = inlined_call_operand.vmem [shape: f32[1,128], index: 4, kind: input, shape index: {}]   ;;  %s3635_s5 = inlined_call_operand.vmem [shape: bf16[128,2], index: 5, kind: input, shape index: {}]   ;;  %s3636_s6 = inlined_call_operand.vmem [shape: f32[1,2], index: 6, kind: input, shape index: {}]   ;;  %s3637_s7 = inlined_call_operand.vmem [shape: f32[1000,2], index: 7, kind: output, shape index: {}]  }
   0x1   :  { %s2887_s26 = smov 0  }
   0x2 LB: > { %s2896_s27 = sadd.s32 4294967295, %s2809_s26   ;;  %s2898_s28 = sadd.s32 1, %s2809_s26   ;;  %s2809_s26 = sphi %s2887_s26, %s3646_s26   ;;  %s2805_s25 = sphi %s2885_s25, %s3645_s25   ;;  %s2801_s24 = sphi %s2883_s24, %s3644_s24  }
   0x3   : > { %s173_s29 = ssub.s32 %s2809_s26, %s2898_s28  ;;  %s176_s30 = sadd.s32 1, %s2805_s25 }
   0x4   : > { %p174_p0 = scmp.eq.s32.totalorder %s173_s29, 0  ;;  %p186_p1 = scmp.ne.s32.totalorder %s2805_s25, %s2801_s24 }
   0x5   : > { %p187_p2 = scmp.eq.s32.totalorder %s2896_s27, 1  ;;  %p2236_p3 = scmp.ge.s32.totalorder %s2809_s26, 1 }
   0x6   : > { %s2906_s8 = scalar_select %p174_p0, %s2805_s25, %s176_s30  }
   0x7   : > { %p2908_p4 = por %p187_p2, %p186_p1  ;;  %p246_p5 = scmp.lt.s32.totalorder %s2809_s26, 3 }
   0x9   : > { %p247_p6 = pnand %p2236_p3, %p246_p5 }
   0xa   : > { %v2734_v0 = vld [vmem:[%s3631_s1] sm:$0xff] (!%p247_p6)   ;;  %s2916_s12 = smul.u32 (!%p247_p6), 63, %s2896_s27  ;;  %vm411_vm0 = vcmask (!%p247_p6), 130048   ;;  %v2736_v28 = vld [vmem:[%s3633_s3 + $0x8] sm:$0xff] (!%p247_p6)   ;;  %v2737_v37 = vld [vmem:[%s3633_s3 + $0x10] sm:$0xff] (!%p247_p6)   ;;  %s278_s22 = sand.u32 (!%p247_p6), 1, %s2801_s24  }
   0xb   : > { %250 = sbr.rel (%p247_p6) target bundleno = 892 (0x37c), region = 48  ;;  %v2735_v1 = vld [vmem:[%s3633_s3] sm:$0xff] (!%p247_p6)   ;;  %2416 = vmatprep.subr.bf16.mxu0 (!%p247_p6), %v2734_v0  ;;  %2642 = vmatprep.subr.bf16.mxu1 (!%p247_p6), %v2734_v0  ;;  %v2738_v40 = vld [vmem:[%s3633_s3 + $0x18] sm:$0xff] (!%p247_p6)   ;;  %v2740_v56 = vld [vmem:[%s3633_s3 + $0x28] sm:$0xff] (!%p247_p6)   ;;  %vm1704_vm1 = vcmask (!%p247_p6), 15360  }
   0xc   : > { %p286_p7 = scmp.lt.s32.totalorder (!%p247_p6), %s2916_s12, 124  ;;  %2417 = vmatpush3.bf16.msra.mxu0 (!%p247_p6), %v2734_v0  ;;  %2643 = vmatpush3.bf16.msra.mxu1 (!%p247_p6), %v2734_v0  ;;  %v2739_v49 = vld [vmem:[%s3633_s3 + $0x20] sm:$0xff] (!%p247_p6)   ;;  %s2644_s23 = smul.u32 (!%p247_p6), 504, %s278_s22 }
   0xd   : > { %2482 = vmatprep.subr.bf16.mxu1 (!%p247_p6), %v2735_v1 }
   0xe   : > { %s3242_s30 = scalar_lea.vmem (!%p247_p6), [#allocation2], %s2644_s23  }
  0x12   : > { %s287_s15 = scalar_select %p286_p7, %s2916_s12, 124 }
  0x13   : > { %s1776_s24 = ssub.s32 (%p2908_p4), 125, %s2916_s12  ;;  %s2302_s10 = smul.u32 (%p2908_p4), 504, %s2896_s27 }
  0x14   : > { %s2237_s16 = sshll.u32 %s287_s15, 3  ;;  %p1777_p8 = scmp.lt.s32.totalorder (%p2908_p4), %s1776_s24, 63 }
  0x15   : > { %s2926_s19 = scalar_lea.vmem %s3630_s0, %s2237_s16  ;;  %s3438_s14 = scalar_lea.vmem (%p2908_p4), %s3637_s7, %s2302_s10  }
  0x16   : > { %v301_v2 = vld [vmem:[%s2926_s19] sm:$0xff]  ;;  %v302_v3 = vld [vmem:[%s2926_s19 + $0x8] sm:$0xff]  ;;  %v303_v4 = vld [vmem:[%s2926_s19 + $0x10] sm:$0xff] }
  0x17   : > { %v364_v5 = vpack.c.bf16 %v302_v3, %v301_v2  ;;  %v304_v6 = vld [vmem:[%s2926_s19 + $0x18] sm:$0xff]  ;;  %v305_v7 = vld [vmem:[%s2926_s19 + $0x20] sm:$0xff]  ;;  %v306_v8 = vld [vmem:[%s2926_s19 + $0x28] sm:$0xff] }
  0x18   : > { %v365_v9 = vpack.c.bf16 %v304_v6, %v303_v4  ;;  %v366_v10 = vpack.c.bf16 %v306_v8, %v305_v7  ;;  %v307_v11 = vld [vmem:[%s2926_s19 + $0x30] sm:$0xff]  ;;  %v308_v12 = vld [vmem:[%s2926_s19 + $0x38] sm:$0xff]  ;;  %v309_v13 = vld [vmem:[%s2926_s19 + $0x40] sm:$0xff] }
  0x19   : > { %2418 = vmatprep.mubr.msk.bf16.mxu0 %vm411_vm0, %v364_v5  ;;  %v310_v14 = vld [vmem:[%s2926_s19 + $0x48] sm:$0xff]  ;;  %v367_v15 = vpack.c.bf16 %v308_v12, %v307_v11  ;;  %v333_v17 = vld [vmem:[%s2926_s19 + $0x100] sm:$0xff]  ;;  %v335_v19 = vld [vmem:[%s2926_s19 + $0x110] sm:$0xff] }
  0x1a   : > { %2419 = vmatmul.mubr.msk.bf16.vlgmr.msra.gmra.mrb[0].mxu0 %vm411_vm0, %v365_v9  ;;  %v368_v16 = vpack.c.bf16 %v310_v14, %v309_v13  ;;  %v334_v18 = vld [vmem:[%s2926_s19 + $0x108] sm:$0xff]  ;;  %v336_v20 = vld [vmem:[%s2926_s19 + $0x118] sm:$0xff]  ;;  %v337_v23 = vld [vmem:[%s2926_s19 + $0x120] sm:$0xff] }
  0x1b   : > { %2422 = vmatprep.mubr.msk.bf16.mxu0 %vm411_vm0, %v366_v10  ;;  %v380_v21 = vpack.c.bf16 %v334_v18, %v333_v17  ;;  %v381_v22 = vpack.c.bf16 %v336_v20, %v335_v19  ;;  %v338_v24 = vld [vmem:[%s2926_s19 + $0x128] sm:$0xff]  ;;  %v311_v25 = vld [vmem:[%s2926_s19 + $0x50] sm:$0xff]  ;;  %v312_v26 = vld [vmem:[%s2926_s19 + $0x58] sm:$0xff] }
  0x1c   : > { %v382_v27 = vpack.c.bf16 %v338_v24, %v337_v23  ;;  %v313_v29 = vld [vmem:[%s2926_s19 + $0x60] sm:$0xff]  ;;  %v314_v30 = vld [vmem:[%s2926_s19 + $0x68] sm:$0xff]  ;;  %v369_v31 = vpack.c.bf16 %v312_v26, %v311_v25  ;;  %v339_v32 = vld [vmem:[%s2926_s19 + $0x130] sm:$0xff] }
  0x1d   : > { %2450 = vmatprep.mubr.msk.bf16.mxu1 %vm411_vm0, %v380_v21  ;;  %v340_v33 = vld [vmem:[%s2926_s19 + $0x138] sm:$0xff]  ;;  %v370_v34 = vpack.c.bf16 %v314_v30, %v313_v29  ;;  %v341_v35 = vld [vmem:[%s2926_s19 + $0x140] sm:$0xff]  ;;  %v342_v36 = vld [vmem:[%s2926_s19 + $0x148] sm:$0xff] }
  0x1e   : > { %2451 = vmatmul.mubr.msk.bf16.vlgmr.msra.gmra.mrb[0].mxu1 %vm411_vm0, %v381_v22  ;;  %v315_v38 = vld [vmem:[%s2926_s19 + $0x70] sm:$0xff]  ;;  %v383_v39 = vpack.c.bf16 %v340_v33, %v339_v32  ;;  %v316_v41 = vld [vmem:[%s2926_s19 + $0x78] sm:$0xff]  ;;  %v317_v42 = vld [vmem:[%s2926_s19 + $0x80] sm:$0xff]  ;;  %v384_v44 = vpack.c.bf16 %v342_v36, %v341_v35 }
  0x1f   : > { %2454 = vmatprep.mubr.msk.bf16.mxu1 %vm411_vm0, %v382_v27  ;;  %2483 = vmatpush3.bf16.msra.mxu1 %v2735_v1  ;;  %v318_v43 = vld [vmem:[%s2926_s19 + $0x88] sm:$0xff]  ;;  %v343_v45 = vld [vmem:[%s2926_s19 + $0x150] sm:$0xff]  ;;  %v344_v46 = vld [vmem:[%s2926_s19 + $0x158] sm:$0xff]  ;;  %v371_v50 = vpack.c.bf16 %v316_v41, %v315_v38 }
  0x20   : > { %2484 = vmatprep.subr.bf16.mxu1 %v2736_v28  ;;  %v345_v47 = vld [vmem:[%s2926_s19 + $0x160] sm:$0xff]  ;;  %v346_v48 = vld [vmem:[%s2926_s19 + $0x168] sm:$0xff]  ;;  %v372_v51 = vpack.c.bf16 %v318_v43, %v317_v42  ;;  %v385_v52 = vpack.c.bf16 %v344_v46, %v343_v45  ;;  %v319_v54 = vld [vmem:[%s2926_s19 + $0x90] sm:$0xff] }
  0x21   : > { %v386_v53 = vpack.c.bf16 %v346_v48, %v345_v47  ;;  %v320_v55 = vld [vmem:[%s2926_s19 + $0x98] sm:$0xff]  ;;  %v321_v57 = vld [vmem:[%s2926_s19 + $0xa0] sm:$0xff]  ;;  %v322_v58 = vld [vmem:[%s2926_s19 + $0xa8] sm:$0xff] }
  0x22   : > { %2423 = vmatmul.mubr.msk.bf16.gmra.mrb[4].mxu0 %vm411_vm0, %v367_v15  ;;  %v373_v59 = vpack.c.bf16 %v320_v55, %v319_v54  ;;  %v347_v60 = vld [vmem:[%s2926_s19 + $0x170] sm:$0xff]  ;;  %v348_v61 = vld [vmem:[%s2926_s19 + $0x178] sm:$0xff]  ;;  %v374_v62 = vpack.c.bf16 %v322_v58, %v321_v57  ;;  %v349_v63 = vld [vmem:[%s2926_s19 + $0x180] sm:$0xff] }
  0x23   : > { %2426 = vmatprep.mubr.msk.bf16.mxu0 %vm411_vm0, %v368_v16  ;;  %2485 = vmatpush3.bf16.msra.mxu1 %v2736_v28  ;;  %v350_v0 = vld [vmem:[%s2926_s19 + $0x188] sm:$0xff]  ;;  %v2741_v1 = vld [vmem:[%s3633_s3 + $0x30] sm:$0xff]   ;;  %v387_v2 = vpack.c.bf16 %v348_v61, %v347_v60  ;;  %v324_v5 = vld [vmem:[%s2926_s19 + $0xb8] sm:$0xff] }
  0x24   : > { %2486 = vmatprep.subr.bf16.mxu1 %v2737_v37  ;;  %v388_v3 = vpack.c.bf16 %v350_v0, %v349_v63  ;;  %v323_v4 = vld [vmem:[%s2926_s19 + $0xb0] sm:$0xff]  ;;  %v325_v6 = vld [vmem:[%s2926_s19 + $0xc0] sm:$0xff]  ;;  %v326_v7 = vld [vmem:[%s2926_s19 + $0xc8] sm:$0xff] }
  0x25   : > { %v375_v8 = vpack.c.bf16 %v324_v5, %v323_v4  ;;  %v351_v9 = vld [vmem:[%s2926_s19 + $0x190] sm:$0xff]  ;;  %v352_v10 = vld [vmem:[%s2926_s19 + $0x198] sm:$0xff]  ;;  %v376_v11 = vpack.c.bf16 %v326_v7, %v325_v6  ;;  %v353_v12 = vld [vmem:[%s2926_s19 + $0x1a0] sm:$0xff] }
  0x26   : > { %2455 = vmatmul.mubr.msk.bf16.gmra.mrb[4].mxu1 %vm411_vm0, %v383_v39  ;;  %v354_v13 = vld [vmem:[%s2926_s19 + $0x1a8] sm:$0xff]  ;;  %v389_v14 = vpack.c.bf16 %v352_v10, %v351_v9  ;;  %v327_v16 = vld [vmem:[%s2926_s19 + $0xd0] sm:$0xff]  ;;  %v328_v17 = vld [vmem:[%s2926_s19 + $0xd8] sm:$0xff] }
  0x27   : > { %2458 = vmatprep.mubr.msk.bf16.mxu1 %vm411_vm0, %v384_v44  ;;  %2487 = vmatpush3.bf16.msra.mxu1 %v2737_v37  ;;  %v390_v15 = vpack.c.bf16 %v354_v13, %v353_v12  ;;  %v329_v18 = vld [vmem:[%s2926_s19 + $0xe0] sm:$0xff]  ;;  %v330_v19 = vld [vmem:[%s2926_s19 + $0xe8] sm:$0xff]  ;;  %v377_v20 = vpack.c.bf16 %v328_v17, %v327_v16  ;;  %v355_v21 = vld [vmem:[%s2926_s19 + $0x1b0] sm:$0xff] }
  0x28   : > { %2488 = vmatprep.subr.bf16.mxu1 %v2738_v40  ;;  %v356_v22 = vld [vmem:[%s2926_s19 + $0x1b8] sm:$0xff]  ;;  %v378_v23 = vpack.c.bf16 %v330_v19, %v329_v18  ;;  %v357_v24 = vld [vmem:[%s2926_s19 + $0x1c0] sm:$0xff]  ;;  %v358_v25 = vld [vmem:[%s2926_s19 + $0x1c8] sm:$0xff] }
  0x29   : > { %v391_v26 = vpack.c.bf16 %v356_v22, %v355_v21  ;;  %v392_v27 = vpack.c.bf16 %v358_v25, %v357_v24  ;;  %v331_v28 = vld [vmem:[%s2926_s19 + $0xf0] sm:$0xff]  ;;  %v332_v29 = vld [vmem:[%s2926_s19 + $0xf8] sm:$0xff]  ;;  %v361_v33 = vld [vmem:[%s2926_s19 + $0x1e0] sm:$0xff] }
  0x2a   : > { %2427 = vmatmul.mubr.msk.bf16.gmra.mrb[8].mxu0 %vm411_vm0, %v369_v31  ;;  %v379_v30 = vpack.c.bf16 %v332_v29, %v331_v28  ;;  %v359_v31 = vld [vmem:[%s2926_s19 + $0x1d0] sm:$0xff]  ;;  %v360_v32 = vld [vmem:[%s2926_s19 + $0x1d8] sm:$0xff]  ;;  %v2743_v48 = vld [vmem:[%s3635_s5] sm:$0xff]  }
  0x2b   : > { %2430 = vmatprep.mubr.msk.bf16.mxu0 %vm411_vm0, %v370_v34  ;;  %2489 = vmatpush3.bf16.msra.mxu1 %v2738_v40  ;;  %v362_v34 = vld [vmem:[%s2926_s19 + $0x1e8] sm:$0xff]  ;;  %v393_v35 = vpack.c.bf16 %v360_v32, %v359_v31  ;;  %v363_v37 = vld [vmem:[%s2926_s19 + $0x1f0] sm:$0xff]  ;;  %v2742_v39 = vld [vmem:[%s3633_s3 + $0x38] sm:$0xff]  }
  0x2c   : > { %2490 = vmatprep.subr.bf16.mxu1 %v2739_v49  ;;  %v394_v36 = vpack.c.bf16 %v362_v34, %v361_v33  ;;  %v395_v38 = vpack.c.bf16 %v363_v37, %v363_v37  ;;  %v3047_v40 = vld [vmem:[%s3632_s2] ss:$0 sm:$0xff]  ;;  %2562 = vmatprep.subr.bf16.mxu0 %v2743_v48  ;;  %v2748_v32 = vld [vmem:[%s3635_s5 + $0x28] sm:$0xff]  }
  0x2d   : > { %2563 = vmatpush3.bf16.msra.mxu0 %v2743_v48  ;;  %v2747_v18 = vld [vmem:[%s3635_s5 + $0x20] sm:$0xff]  }
  0x2e   : > { %2459 = vmatmul.mubr.msk.bf16.gmra.mrb[8].mxu1 %vm411_vm0, %v385_v52 }
  0x2f   : > { %2462 = vmatprep.mubr.msk.bf16.mxu1 %vm411_vm0, %v386_v53  ;;  %2491 = vmatpush3.bf16.msra.mxu1 %v2739_v49  ;;  %v2744_v49 = vld [vmem:[%s3635_s5 + $0x8] sm:$0xff]  }
  0x30   : > { %2492 = vmatprep.subr.bf16.mxu1 %v2740_v56  ;;  %2564 = vmatprep.subr.bf16.mxu0 %v2744_v49 }
  0x31   : > { %2565 = vmatpush3.bf16.msra.mxu0 %v2744_v49  ;;  %v2749_v49 = vld [vmem:[%s3635_s5 + $0x30] sm:$0xff]  }
  0x32   : > { %2431 = vmatmul.mubr.msk.bf16.gmra.mrb[12].mxu0 %vm411_vm0, %v371_v50 }
  0x33   : > { %2434 = vmatprep.mubr.msk.bf16.mxu0 %vm411_vm0, %v372_v51  ;;  %2493 = vmatpush3.bf16.msra.mxu1 %v2740_v56  ;;  %v2745_v56 = vld [vmem:[%s3635_s5 + $0x10] sm:$0xff]  }
  0x34   : > { %2494 = vmatprep.subr.bf16.mxu1 %v2741_v1  ;;  %2566 = vmatprep.subr.bf16.mxu0 %v2745_v56 }
  0x35   : > { %2567 = vmatpush3.bf16.msra.mxu0 %v2745_v56 }
  0x36   : > { %2463 = vmatmul.mubr.msk.bf16.gmra.mrb[12].mxu1 %vm411_vm0, %v387_v2  ;;  %v2746_v2 = vld [vmem:[%s3635_s5 + $0x18] sm:$0xff]  }
  0x37   : > { %2466 = vmatprep.mubr.msk.bf16.mxu1 %vm411_vm0, %v388_v3  ;;  %2495 = vmatpush3.bf16.msra.mxu1 %v2741_v1 }
  0x38   : > { %2496 = vmatprep.subr.bf16.mxu1 %v2742_v39  ;;  %2568 = vmatprep.subr.bf16.mxu0 %v2746_v2 }
  0x39   : > { %2569 = vmatpush3.bf16.msra.mxu0 %v2746_v2 }
  0x3a   : > { %2435 = vmatmul.mubr.msk.bf16.gmra.mrb[16].mxu0 %vm411_vm0, %v373_v59  ;;  %2570 = vmatprep.subr.bf16.mxu0 %v2747_v18 }
  0x3b   : > { %2438 = vmatprep.mubr.msk.bf16.mxu0 %vm411_vm0, %v374_v62  ;;  %2497 = vmatpush3.bf16.msra.mxu1 %v2742_v39 }
  0x3d   : > { %2571 = vmatpush3.bf16.msra.mxu0 %v2747_v18 }
  0x3e   : > { %2467 = vmatmul.mubr.msk.bf16.gmra.mrb[16].mxu1 %vm411_vm0, %v389_v14  ;;  %2572 = vmatprep.subr.bf16.mxu0 %v2748_v32 }
  0x3f   : > { %2470 = vmatprep.mubr.msk.bf16.mxu1 %vm411_vm0, %v390_v15 }
  0x41   : > { %2573 = vmatpush3.bf16.msra.mxu0 %v2748_v32 }
  0x42   : > { %2439 = vmatmul.mubr.msk.bf16.gmra.mrb[20].mxu0 %vm411_vm0, %v375_v8  ;;  %2574 = vmatprep.subr.bf16.mxu0 %v2749_v49 }
  0x43   : > { %2442 = vmatprep.mubr.msk.bf16.mxu0 %vm411_vm0, %v376_v11 }
  0x45   : > { %2575 = vmatpush3.bf16.msra.mxu0 %v2749_v49 }
  0x46   : > { %2471 = vmatmul.mubr.msk.bf16.gmra.mrb[20].mxu1 %vm411_vm0, %v391_v26 }
  0x47   : > { %2474 = vmatprep.mubr.msk.bf16.mxu1 %vm411_vm0, %v392_v27 }
  0x4a   : > { %2443 = vmatmul.mubr.msk.bf16.gmra.mrb[24].mxu0 %vm411_vm0, %v377_v20 }
  0x4b   : > { %2446 = vmatprep.mubr.msk.bf16.mxu0 %vm411_vm0, %v378_v23 }
  0x4e   : > { %2475 = vmatmul.mubr.msk.bf16.gmra.mrb[24].mxu1 %vm411_vm0, %v393_v35 }
  0x4f   : > { %2478 = vmatprep.mubr.msk.bf16.mxu1 %vm411_vm0, %v394_v36 }
  0x52   : > { %2447 = vmatmul.mubr.msk.bf16.gmra.mrb[28].mxu0 %vm411_vm0, %v379_v30 }
  0x56   : > { %2479 = vmatmul.mubr.msk.bf16.gmra.mrb[28].mxu1 %vm411_vm0, %v395_v38 }
  0xed   : > { %v2420_v41 = vpop.f32.mrb[0].mxu0 }
  0xee   : > { %v551_v42 = vadd.f32 %v2420_v41, %v3047_v40  ;;  %v542_v43 = vpop.f32.mrb[1].mxu0 }
  0xef   : > { %v543_v44 = vadd.f32 %v3047_v40, %v542_v43  ;;  %v2421_v45 = vpop.f32.mrb[2].mxu0 }
  0xf0   : > { %v554_v46 = vadd.f32 %v2421_v45, %v3047_v40  ;;  %v545_v47 = vpop.f32.mrb[3].mxu0  ;;  %v798_v51 = vmax.f32 %v551_v42, 0.0 }
  0xf1   : > { %v546_v50 = vadd.f32 %v3047_v40, %v545_v47  ;;  %v796_v53 = vmax.f32 %v543_v44, 0.0  ;;  %v2452_v1 = vpop.f32.mrb[0].mxu1 }
  0xf2   : > { %v799_v52 = vmax.f32 %v554_v46, 0.0  ;;  %v679_v4 = vadd.f32 %v2452_v1, %v3047_v40  ;;  %v670_v5 = vpop.f32.mrb[1].mxu1 }
  0xf3   : > { %v797_v54 = vmax.f32 %v546_v50, 0.0  ;;  %v671_v8 = vadd.f32 %v3047_v40, %v670_v5  ;;  %v2453_v9 = vpop.f32.mrb[2].mxu1 }
  0xf4   : > { %v860_v55 = vpack.c.bf16 %v799_v52, %v798_v51  ;;  %v830_v12 = vmax.f32 %v679_v4, 0.0  ;;  %v682_v13 = vadd.f32 %v2453_v9, %v3047_v40  ;;  %v673_v14 = vpop.f32.mrb[3].mxu1 }
  0xf5   : > { %v859_v57 = vpack.c.bf16 %v797_v54, %v796_v53  ;;  %v2424_v58 = vpop.f32.mrb[4].mxu0  ;;  %v828_v16 = vmax.f32 %v671_v8, 0.0  ;;  %v674_v17 = vadd.f32 %v3047_v40, %v673_v14 }
  0xf6   : > { %v567_v59 = vadd.f32 %v2424_v58, %v3047_v40  ;;  %v558_v60 = vpop.f32.mrb[5].mxu0  ;;  %v831_v21 = vmax.f32 %v682_v13, 0.0 }
  0xf7   : > { %v559_v61 = vadd.f32 %v3047_v40, %v558_v60  ;;  %v2425_v62 = vpop.f32.mrb[6].mxu0  ;;  %2498 = vmatprep.mubr.bf16.mxu1 %v859_v57  ;;  %v829_v24 = vmax.f32 %v674_v17, 0.0 }
  0xf8   : > { %v570_v63 = vadd.f32 %v2425_v62, %v3047_v40  ;;  %v561_v0 = vpop.f32.mrb[7].mxu0  ;;  %2499 = vmatmul.mubr.bf16.vlgmr.msra.gmra.mrb[32].mxu1 %v860_v55  ;;  %v802_v6 = vmax.f32 %v567_v59, 0.0  ;;  %v3078_v27 = vpack.c.bf16 %v831_v21, %v830_v12 }
  0xf9   : > { %v562_v3 = vadd.f32 %v3047_v40, %v561_v0  ;;  %v800_v10 = vmax.f32 %v559_v61, 0.0  ;;  %v3081_v30 = vpack.c.bf16 %v829_v24, %v828_v16  ;;  %v2456_v31 = vpop.f32.mrb[4].mxu1 }
  0xfa   : > { %v803_v7 = vmax.f32 %v570_v63, 0.0  ;;  %v695_v34 = vadd.f32 %v2456_v31, %v3047_v40  ;;  %v686_v35 = vpop.f32.mrb[5].mxu1 }
  0xfb   : > { %v801_v11 = vmax.f32 %v562_v3, 0.0  ;;  %v687_v38 = vadd.f32 %v3047_v40, %v686_v35  ;;  %v2457_v39 = vpop.f32.mrb[6].mxu1 }
  0xfc   : > { %v862_v15 = vpack.c.bf16 %v803_v7, %v802_v6  ;;  %v834_v43 = vmax.f32 %v695_v34, 0.0  ;;  %v698_v44 = vadd.f32 %v2457_v39, %v3047_v40  ;;  %v689_v45 = vpop.f32.mrb[7].mxu1 }
  0xfd   : > { %v861_v19 = vpack.c.bf16 %v801_v11, %v800_v10  ;;  %v2428_v20 = vpop.f32.mrb[8].mxu0  ;;  %v832_v47 = vmax.f32 %v687_v38, 0.0  ;;  %v690_v48 = vadd.f32 %v3047_v40, %v689_v45 }
  0xfe   : > { %v583_v22 = vadd.f32 %v2428_v20, %v3047_v40  ;;  %v574_v23 = vpop.f32.mrb[9].mxu0  ;;  %v835_v52 = vmax.f32 %v698_v44, 0.0 }
  0xff   : > { %v575_v25 = vadd.f32 %v3047_v40, %v574_v23  ;;  %v2429_v26 = vpop.f32.mrb[10].mxu0  ;;  %2502 = vmatprep.mubr.bf16.mxu1 %v861_v19  ;;  %v833_v55 = vmax.f32 %v690_v48, 0.0 }
 0x100   : > { %v586_v28 = vadd.f32 %v2429_v26, %v3047_v40  ;;  %v577_v29 = vpop.f32.mrb[11].mxu0  ;;  %2503 = vmatmul.mubr.bf16.gmra.mrb[36].mxu1 %v862_v15  ;;  %v806_v36 = vmax.f32 %v583_v22, 0.0  ;;  %v3096_v58 = vpack.c.bf16 %v835_v52, %v834_v43 }
 0x101   : > { %v578_v33 = vadd.f32 %v3047_v40, %v577_v29  ;;  %v804_v41 = vmax.f32 %v575_v25, 0.0  ;;  %v3099_v61 = vpack.c.bf16 %v833_v55, %v832_v47  ;;  %v2460_v62 = vpop.f32.mrb[8].mxu1 }
 0x102   : > { %v807_v37 = vmax.f32 %v586_v28, 0.0  ;;  %v711_v0 = vadd.f32 %v2460_v62, %v3047_v40  ;;  %v702_v1 = vpop.f32.mrb[9].mxu1 }
 0x103   : > { %v805_v42 = vmax.f32 %v578_v33, 0.0  ;;  %v703_v4 = vadd.f32 %v3047_v40, %v702_v1  ;;  %v2461_v5 = vpop.f32.mrb[10].mxu1 }
 0x104   : > { %v864_v46 = vpack.c.bf16 %v807_v37, %v806_v36  ;;  %v838_v8 = vmax.f32 %v711_v0, 0.0  ;;  %v714_v9 = vadd.f32 %v2461_v5, %v3047_v40  ;;  %v705_v10 = vpop.f32.mrb[11].mxu1 }
 0x105   : > { %v863_v50 = vpack.c.bf16 %v805_v42, %v804_v41  ;;  %v2432_v51 = vpop.f32.mrb[12].mxu0  ;;  %v836_v12 = vmax.f32 %v703_v4, 0.0  ;;  %v706_v13 = vadd.f32 %v3047_v40, %v705_v10 }
 0x106   : > { %v599_v53 = vadd.f32 %v2432_v51, %v3047_v40  ;;  %v590_v54 = vpop.f32.mrb[13].mxu0  ;;  %v839_v16 = vmax.f32 %v714_v9, 0.0 }
 0x107   : > { %v591_v56 = vadd.f32 %v3047_v40, %v590_v54  ;;  %v2433_v57 = vpop.f32.mrb[14].mxu0  ;;  %2506 = vmatprep.mubr.bf16.mxu1 %v863_v50  ;;  %v837_v19 = vmax.f32 %v706_v13, 0.0 }
 0x108   : > { %v602_v59 = vadd.f32 %v2433_v57, %v3047_v40  ;;  %v593_v60 = vpop.f32.mrb[15].mxu0  ;;  %2507 = vmatmul.mubr.bf16.gmra.mrb[40].mxu1 %v864_v46  ;;  %v810_v2 = vmax.f32 %v599_v53, 0.0  ;;  %v3108_v22 = vpack.c.bf16 %v839_v16, %v838_v8 }
 0x109   : > { %v594_v63 = vadd.f32 %v3047_v40, %v593_v60  ;;  %v808_v6 = vmax.f32 %v591_v56, 0.0  ;;  %v3111_v25 = vpack.c.bf16 %v837_v19, %v836_v12  ;;  %v2464_v26 = vpop.f32.mrb[12].mxu1 }
 0x10a   : > { %v811_v3 = vmax.f32 %v602_v59, 0.0  ;;  %v727_v29 = vadd.f32 %v2464_v26, %v3047_v40  ;;  %v718_v31 = vpop.f32.mrb[13].mxu1 }
 0x10b   : > { %v809_v7 = vmax.f32 %v594_v63, 0.0  ;;  %v719_v34 = vadd.f32 %v3047_v40, %v718_v31  ;;  %v2465_v35 = vpop.f32.mrb[14].mxu1 }
 0x10c   : > { %v866_v11 = vpack.c.bf16 %v811_v3, %v810_v2  ;;  %v842_v38 = vmax.f32 %v727_v29, 0.0  ;;  %v730_v39 = vadd.f32 %v2465_v35, %v3047_v40  ;;  %v721_v41 = vpop.f32.mrb[15].mxu1 }
 0x10d   : > { %v865_v14 = vpack.c.bf16 %v809_v7, %v808_v6  ;;  %v2436_v15 = vpop.f32.mrb[16].mxu0  ;;  %v840_v43 = vmax.f32 %v719_v34, 0.0  ;;  %v722_v44 = vadd.f32 %v3047_v40, %v721_v41 }
 0x10e   : > { %v615_v17 = vadd.f32 %v2436_v15, %v3047_v40  ;;  %v606_v18 = vpop.f32.mrb[17].mxu0  ;;  %v843_v47 = vmax.f32 %v730_v39, 0.0 }
 0x10f   : > { %v607_v20 = vadd.f32 %v3047_v40, %v606_v18  ;;  %v2437_v21 = vpop.f32.mrb[18].mxu0  ;;  %2510 = vmatprep.mubr.bf16.mxu1 %v865_v14  ;;  %v841_v50 = vmax.f32 %v722_v44, 0.0 }
 0x110   : > { %v618_v23 = vadd.f32 %v2437_v21, %v3047_v40  ;;  %v609_v24 = vpop.f32.mrb[19].mxu0  ;;  %2511 = vmatmul.mubr.bf16.gmra.mrb[44].mxu1 %v866_v11  ;;  %v814_v32 = vmax.f32 %v615_v17, 0.0  ;;  %v3120_v53 = vpack.c.bf16 %v843_v47, %v842_v38 }
 0x111   : > { %v610_v28 = vadd.f32 %v3047_v40, %v609_v24  ;;  %v812_v36 = vmax.f32 %v607_v20, 0.0  ;;  %v3123_v56 = vpack.c.bf16 %v841_v50, %v840_v43  ;;  %v2468_v57 = vpop.f32.mrb[16].mxu1 }
 0x112   : > { %v815_v33 = vmax.f32 %v618_v23, 0.0  ;;  %v743_v60 = vadd.f32 %v2468_v57, %v3047_v40  ;;  %v734_v62 = vpop.f32.mrb[17].mxu1 }
 0x113   : > { %v813_v37 = vmax.f32 %v610_v28, 0.0  ;;  %v735_v1 = vadd.f32 %v3047_v40, %v734_v62  ;;  %v2469_v2 = vpop.f32.mrb[18].mxu1 }
 0x114   : > { %v868_v42 = vpack.c.bf16 %v815_v33, %v814_v32  ;;  %v846_v5 = vmax.f32 %v743_v60, 0.0  ;;  %v746_v6 = vadd.f32 %v2469_v2, %v3047_v40  ;;  %v737_v7 = vpop.f32.mrb[19].mxu1 }
 0x115   : > { %v867_v45 = vpack.c.bf16 %v813_v37, %v812_v36  ;;  %v2440_v46 = vpop.f32.mrb[20].mxu0  ;;  %v844_v9 = vmax.f32 %v735_v1, 0.0  ;;  %v738_v10 = vadd.f32 %v3047_v40, %v737_v7 }
 0x116   : > { %v631_v48 = vadd.f32 %v2440_v46, %v3047_v40  ;;  %v622_v49 = vpop.f32.mrb[21].mxu0  ;;  %v847_v13 = vmax.f32 %v746_v6, 0.0 }
 0x117   : > { %v623_v51 = vadd.f32 %v3047_v40, %v622_v49  ;;  %v2441_v52 = vpop.f32.mrb[22].mxu0  ;;  %2514 = vmatprep.mubr.bf16.mxu1 %v867_v45  ;;  %v845_v16 = vmax.f32 %v738_v10, 0.0 }
 0x118   : > { %v634_v54 = vadd.f32 %v2441_v52, %v3047_v40  ;;  %v625_v55 = vpop.f32.mrb[23].mxu0  ;;  %2515 = vmatmul.mubr.bf16.gmra.mrb[48].mxu1 %v868_v42  ;;  %v818_v63 = vmax.f32 %v631_v48, 0.0  ;;  %v3132_v19 = vpack.c.bf16 %v847_v13, %v846_v5 }
 0x119   : > { %v626_v59 = vadd.f32 %v3047_v40, %v625_v55  ;;  %v816_v3 = vmax.f32 %v623_v51, 0.0  ;;  %v3135_v23 = vpack.c.bf16 %v845_v16, %v844_v9  ;;  %v2472_v24 = vpop.f32.mrb[20].mxu1 }
 0x11a   : > { %v819_v0 = vmax.f32 %v634_v54, 0.0  ;;  %v759_v28 = vadd.f32 %v2472_v24, %v3047_v40  ;;  %v750_v29 = vpop.f32.mrb[21].mxu1 }
 0x11b   : > { %v817_v4 = vmax.f32 %v626_v59, 0.0  ;;  %v751_v33 = vadd.f32 %v3047_v40, %v750_v29  ;;  %v2473_v34 = vpop.f32.mrb[22].mxu1 }
 0x11c   : > { %v870_v8 = vpack.c.bf16 %v819_v0, %v818_v63  ;;  %v850_v37 = vmax.f32 %v759_v28, 0.0  ;;  %v762_v38 = vadd.f32 %v2473_v34, %v3047_v40  ;;  %v753_v39 = vpop.f32.mrb[23].mxu1 }
 0x11d   : > { %v869_v11 = vpack.c.bf16 %v817_v4, %v816_v3  ;;  %v2444_v12 = vpop.f32.mrb[24].mxu0  ;;  %v848_v42 = vmax.f32 %v751_v33, 0.0  ;;  %v754_v43 = vadd.f32 %v3047_v40, %v753_v39 }
 0x11e   : > { %v647_v14 = vadd.f32 %v2444_v12, %v3047_v40  ;;  %v638_v15 = vpop.f32.mrb[25].mxu0  ;;  %v851_v46 = vmax.f32 %v762_v38, 0.0 }
 0x11f   : > { %v639_v17 = vadd.f32 %v3047_v40, %v638_v15  ;;  %v2445_v18 = vpop.f32.mrb[26].mxu0  ;;  %2518 = vmatprep.mubr.bf16.mxu1 %v869_v11  ;;  %v849_v49 = vmax.f32 %v754_v43, 0.0 }
 0x120   : > { %v650_v20 = vadd.f32 %v2445_v18, %v3047_v40  ;;  %v641_v21 = vpop.f32.mrb[27].mxu0  ;;  %2519 = vmatmul.mubr.bf16.gmra.mrb[52].mxu1 %v870_v8  ;;  %v822_v31 = vmax.f32 %v647_v14, 0.0  ;;  %v886_v52 = vpack.c.bf16 %v851_v46, %v850_v37 }
 0x121   : > { %v642_v26 = vadd.f32 %v3047_v40, %v641_v21  ;;  %v820_v35 = vmax.f32 %v639_v17, 0.0  ;;  %v885_v57 = vpack.c.bf16 %v849_v49, %v848_v42  ;;  %v2476_v59 = vpop.f32.mrb[24].mxu1 }
 0x122   : > { %v823_v32 = vmax.f32 %v650_v20, 0.0  ;;  %v775_v62 = vadd.f32 %v2476_v59, %v3047_v40  ;;  %v766_v63 = vpop.f32.mrb[25].mxu1 }
 0x123   : > { %v821_v36 = vmax.f32 %v642_v26, 0.0  ;;  %v767_v2 = vadd.f32 %v3047_v40, %v766_v63  ;;  %v2477_v3 = vpop.f32.mrb[26].mxu1 }
 0x124   : > { %v872_v41 = vpack.c.bf16 %v823_v32, %v822_v31  ;;  %v854_v6 = vmax.f32 %v775_v62, 0.0  ;;  %v778_v7 = vadd.f32 %v2477_v3, %v3047_v40  ;;  %v769_v8 = vpop.f32.mrb[27].mxu1 }
 0x125   : > { %v871_v44 = vpack.c.bf16 %v821_v36, %v820_v35  ;;  %v2448_v45 = vpop.f32.mrb[28].mxu0  ;;  %v852_v10 = vmax.f32 %v767_v2, 0.0  ;;  %v770_v11 = vadd.f32 %v3047_v40, %v769_v8 }
 0x126   : > { %v663_v47 = vadd.f32 %v2448_v45, %v3047_v40  ;;  %v654_v48 = vpop.f32.mrb[29].mxu0  ;;  %v855_v13 = vmax.f32 %v778_v7, 0.0 }
 0x127   : > { %v655_v50 = vadd.f32 %v3047_v40, %v654_v48  ;;  %v2449_v51 = vpop.f32.mrb[30].mxu0  ;;  %2522 = vmatprep.mubr.bf16.mxu1 %v871_v44  ;;  %v853_v14 = vmax.f32 %v770_v11, 0.0 }
 0x128   : > { %v666_v54 = vadd.f32 %v2449_v51, %v3047_v40  ;;  %v657_v55 = vpop.f32.mrb[31].mxu0  ;;  %2523 = vmatmul.mubr.bf16.gmra.mrb[56].mxu1 %v872_v41  ;;  %v826_v0 = vmax.f32 %v663_v47, 0.0  ;;  %v888_v15 = vpack.c.bf16 %v855_v13, %v854_v6 }
 0x129   : > { %v658_v60 = vadd.f32 %v3047_v40, %v657_v55  ;;  %v824_v4 = vmax.f32 %v655_v50, 0.0  ;;  %v887_v16 = vpack.c.bf16 %v853_v14, %v852_v10  ;;  %v2480_v17 = vpop.f32.mrb[28].mxu1 }
 0x12a   : > { %v827_v1 = vmax.f32 %v666_v54, 0.0  ;;  %v782_v18 = vpop.f32.mrb[29].mxu1 }
 0x12b   : > { %v825_v5 = vmax.f32 %v658_v60, 0.0  ;;  %v783_v20 = vadd.f32 %v3047_v40, %v782_v18  ;;  %v2481_v21 = vpop.f32.mrb[30].mxu1 }
 0x12c   : > { %v874_v9 = vpack.c.bf16 %v827_v1, %v826_v0  ;;  %v785_v24 = vpop.f32.mrb[31].mxu1 }
 0x12d   : > { %v873_v12 = vpack.c.bf16 %v825_v5, %v824_v4  ;;  %v856_v26 = vmax.f32 %v783_v20, 0.0  ;;  %v786_v28 = vadd.f32 %v3047_v40, %v785_v24 }
 0x12f   : > { %2526 = vmatprep.mubr.bf16.mxu1 %v873_v12  ;;  %v857_v29 = vmax.f32 %v786_v28, 0.0 }
 0x130   : > { %2527 = vmatmul.mubr.bf16.gmra.mrb[60].mxu1 %v874_v9 }
 0x131   : > { %2530 = vmatprep.mubr.bf16.mxu1 %v3081_v30  ;;  %v889_v31 = vpack.c.bf16 %v857_v29, %v856_v26  ;;  %v2750_v30 = vld [vmem:[%s3635_s5 + $0x38] sm:$0xff]  }
 0x132   : > { %2576 = vmatprep.subr.bf16.mxu0 %v2750_v30 }
 0x133   : > { %2577 = vmatpush3.bf16.msra.mxu0 %v2750_v30 }
 0x138   : > { %2531 = vmatmul.mubr.bf16.gmra.mrb[64].mxu1 %v3078_v27  ;;  %v791_v27 = vadd.f32 %v2480_v17, %v3047_v40 }
 0x139   : > { %2534 = vmatprep.mubr.bf16.mxu1 %v3099_v61 }
 0x140   : > { %2535 = vmatmul.mubr.bf16.gmra.mrb[68].mxu1 %v3096_v58  ;;  %v858_v58 = vmax.f32 %v791_v27, 0.0 }
 0x141   : > { %2538 = vmatprep.mubr.bf16.mxu1 %v3111_v25 }
 0x142   : > { %v890_v61 = vpack.c.bf16 %v858_v58, %v858_v58 }
 0x148   : > { %2539 = vmatmul.mubr.bf16.gmra.mrb[72].mxu1 %v3108_v22  ;;  %v3169_v22 = vld [vmem:[%s3634_s4] ss:$0 sm:$0xff] }
 0x149   : > { %2542 = vmatprep.mubr.bf16.mxu1 %v3123_v56 }
 0x150   : > { %2543 = vmatmul.mubr.bf16.gmra.mrb[76].mxu1 %v3120_v53 }
 0x151   : > { %2546 = vmatprep.mubr.bf16.mxu1 %v3135_v23 }
 0x158   : > { %2547 = vmatmul.mubr.bf16.gmra.mrb[80].mxu1 %v3132_v19 }
 0x159   : > { %2550 = vmatprep.mubr.bf16.mxu1 %v885_v57 }
 0x160   : > { %2551 = vmatmul.mubr.bf16.gmra.mrb[84].mxu1 %v886_v52 }
 0x161   : > { %2554 = vmatprep.mubr.bf16.mxu1 %v887_v16 }
 0x168   : > { %2555 = vmatmul.mubr.bf16.gmra.mrb[88].mxu1 %v888_v15 }
 0x169   : > { %2558 = vmatprep.mubr.bf16.mxu1 %v889_v31 }
 0x170   : > { %2559 = vmatmul.mubr.bf16.gmra.mrb[92].mxu1 %v890_v61 }
 0x1cb   : > { %v2500_v25 = vpop.f32.mrb[32].mxu1 }
 0x1cc   : > { %v1005_v53 = vadd.f32 %v2500_v25, %v3169_v22  ;;  %v996_v56 = vpop.f32.mrb[33].mxu1 }
 0x1cd   : > { %v997_v19 = vadd.f32 %v3169_v22, %v996_v56  ;;  %v2501_v23 = vpop.f32.mrb[34].mxu1 }
 0x1ce   : > { %v1008_v32 = vadd.f32 %v2501_v23, %v3169_v22  ;;  %v999_v40 = vpop.f32.mrb[35].mxu1  ;;  %v1252_v34 = vmax.f32 %v1005_v53, 0.0 }
 0x1cf   : > { %v1000_v33 = vadd.f32 %v3169_v22, %v999_v40  ;;  %v1250_v36 = vmax.f32 %v997_v19, 0.0 }
 0x1d0   : > { %v1253_v35 = vmax.f32 %v1008_v32, 0.0 }
 0x1d1   : > { %v1251_v37 = vmax.f32 %v1000_v33, 0.0 }
 0x1d2   : > { %v1314_v38 = vpack.c.bf16 %v1253_v35, %v1252_v34 }
 0x1d3   : > { %v1313_v39 = vpack.c.bf16 %v1251_v37, %v1250_v36  ;;  %v2504_v41 = vpop.f32.mrb[36].mxu1 }
 0x1d4   : > { %v1021_v42 = vadd.f32 %v2504_v41, %v3169_v22  ;;  %v1012_v43 = vpop.f32.mrb[37].mxu1 }
 0x1d5   : > { %v1013_v44 = vadd.f32 %v3169_v22, %v1012_v43  ;;  %v2505_v45 = vpop.f32.mrb[38].mxu1  ;;  %2578 = vmatprep.mubr.bf16.mxu0 %v1313_v39 }
 0x1d6   : > { %v1024_v46 = vadd.f32 %v2505_v45, %v3169_v22  ;;  %v1015_v47 = vpop.f32.mrb[39].mxu1  ;;  %2579 = vmatmul.mubr.bf16.vlgmr.msra.gmra.mrb[32].mxu0 %v1314_v38  ;;  %v1256_v49 = vmax.f32 %v1021_v42, 0.0 }
 0x1d7   : > { %v1016_v48 = vadd.f32 %v3169_v22, %v1015_v47  ;;  %v1254_v51 = vmax.f32 %v1013_v44, 0.0 }
 0x1d8   : > { %v1257_v50 = vmax.f32 %v1024_v46, 0.0 }
 0x1d9   : > { %v1255_v52 = vmax.f32 %v1016_v48, 0.0 }
 0x1da   : > { %v1316_v54 = vpack.c.bf16 %v1257_v50, %v1256_v49 }
 0x1db   : > { %v1315_v55 = vpack.c.bf16 %v1255_v52, %v1254_v51  ;;  %v2508_v57 = vpop.f32.mrb[40].mxu1 }
 0x1dc   : > { %v1037_v59 = vadd.f32 %v2508_v57, %v3169_v22  ;;  %v1028_v60 = vpop.f32.mrb[41].mxu1 }
 0x1dd   : > { %v1029_v62 = vadd.f32 %v3169_v22, %v1028_v60  ;;  %v2509_v63 = vpop.f32.mrb[42].mxu1  ;;  %2582 = vmatprep.mubr.bf16.mxu0 %v1315_v55 }
 0x1de   : > { %v1040_v0 = vadd.f32 %v2509_v63, %v3169_v22  ;;  %v1031_v1 = vpop.f32.mrb[43].mxu1  ;;  %2583 = vmatmul.mubr.bf16.gmra.mrb[36].mxu0 %v1316_v54  ;;  %v1260_v3 = vmax.f32 %v1037_v59, 0.0 }
 0x1df   : > { %v1032_v2 = vadd.f32 %v3169_v22, %v1031_v1  ;;  %v1258_v5 = vmax.f32 %v1029_v62, 0.0 }
 0x1e0   : > { %v1261_v4 = vmax.f32 %v1040_v0, 0.0 }
 0x1e1   : > { %v1259_v6 = vmax.f32 %v1032_v2, 0.0 }
 0x1e2   : > { %v1318_v7 = vpack.c.bf16 %v1261_v4, %v1260_v3 }
 0x1e3   : > { %v1317_v8 = vpack.c.bf16 %v1259_v6, %v1258_v5  ;;  %v2512_v9 = vpop.f32.mrb[44].mxu1 }
 0x1e4   : > { %v1053_v10 = vadd.f32 %v2512_v9, %v3169_v22  ;;  %v1044_v11 = vpop.f32.mrb[45].mxu1 }
 0x1e5   : > { %v1045_v12 = vadd.f32 %v3169_v22, %v1044_v11  ;;  %v2513_v13 = vpop.f32.mrb[46].mxu1  ;;  %2586 = vmatprep.mubr.bf16.mxu0 %v1317_v8 }
 0x1e6   : > { %v1056_v14 = vadd.f32 %v2513_v13, %v3169_v22  ;;  %v1047_v15 = vpop.f32.mrb[47].mxu1  ;;  %2587 = vmatmul.mubr.bf16.gmra.mrb[40].mxu0 %v1318_v7  ;;  %v1264_v17 = vmax.f32 %v1053_v10, 0.0 }
 0x1e7   : > { %v1048_v16 = vadd.f32 %v3169_v22, %v1047_v15  ;;  %v1262_v20 = vmax.f32 %v1045_v12, 0.0 }
 0x1e8   : > { %v1265_v18 = vmax.f32 %v1056_v14, 0.0 }
 0x1e9   : > { %v1263_v21 = vmax.f32 %v1048_v16, 0.0 }
 0x1ea   : > { %v1320_v24 = vpack.c.bf16 %v1265_v18, %v1264_v17 }
 0x1eb   : > { %v1319_v26 = vpack.c.bf16 %v1263_v21, %v1262_v20  ;;  %v2516_v28 = vpop.f32.mrb[48].mxu1 }
 0x1ec   : > { %v1069_v29 = vadd.f32 %v2516_v28, %v3169_v22  ;;  %v1060_v31 = vpop.f32.mrb[49].mxu1 }
 0x1ed   : > { %v1061_v30 = vadd.f32 %v3169_v22, %v1060_v31  ;;  %v2517_v27 = vpop.f32.mrb[50].mxu1  ;;  %2590 = vmatprep.mubr.bf16.mxu0 %v1319_v26 }
 0x1ee   : > { %v1072_v58 = vadd.f32 %v2517_v27, %v3169_v22  ;;  %v1063_v61 = vpop.f32.mrb[51].mxu1  ;;  %2591 = vmatmul.mubr.bf16.gmra.mrb[44].mxu0 %v1320_v24  ;;  %v1268_v53 = vmax.f32 %v1069_v29, 0.0 }
 0x1ef   : > { %v1064_v25 = vadd.f32 %v3169_v22, %v1063_v61  ;;  %v1266_v19 = vmax.f32 %v1061_v30, 0.0 }
 0x1f0   : > { %v1269_v56 = vmax.f32 %v1072_v58, 0.0 }
 0x1f1   : > { %v1267_v23 = vmax.f32 %v1064_v25, 0.0 }
 0x1f2   : > { %v1322_v32 = vpack.c.bf16 %v1269_v56, %v1268_v53 }
 0x1f3   : > { %v1321_v40 = vpack.c.bf16 %v1267_v23, %v1266_v19  ;;  %v2520_v33 = vpop.f32.mrb[52].mxu1 }
 0x1f4   : > { %v1085_v34 = vadd.f32 %v2520_v33, %v3169_v22  ;;  %v1076_v35 = vpop.f32.mrb[53].mxu1 }
 0x1f5   : > { %v1077_v36 = vadd.f32 %v3169_v22, %v1076_v35  ;;  %v2521_v37 = vpop.f32.mrb[54].mxu1  ;;  %2594 = vmatprep.mubr.bf16.mxu0 %v1321_v40 }
 0x1f6   : > { %v1088_v38 = vadd.f32 %v2521_v37, %v3169_v22  ;;  %v1079_v39 = vpop.f32.mrb[55].mxu1  ;;  %2595 = vmatmul.mubr.bf16.gmra.mrb[48].mxu0 %v1322_v32  ;;  %v1272_v42 = vmax.f32 %v1085_v34, 0.0 }
 0x1f7   : > { %v1080_v41 = vadd.f32 %v3169_v22, %v1079_v39  ;;  %v1270_v44 = vmax.f32 %v1077_v36, 0.0 }
 0x1f8   : > { %v1273_v43 = vmax.f32 %v1088_v38, 0.0 }
 0x1f9   : > { %v1271_v45 = vmax.f32 %v1080_v41, 0.0 }
 0x1fa   : > { %v1324_v46 = vpack.c.bf16 %v1273_v43, %v1272_v42 }
 0x1fb   : > { %v1323_v47 = vpack.c.bf16 %v1271_v45, %v1270_v44  ;;  %v2524_v48 = vpop.f32.mrb[56].mxu1 }
 0x1fc   : > { %v1101_v49 = vadd.f32 %v2524_v48, %v3169_v22  ;;  %v1092_v50 = vpop.f32.mrb[57].mxu1 }
 0x1fd   : > { %v1093_v51 = vadd.f32 %v3169_v22, %v1092_v50  ;;  %v2525_v52 = vpop.f32.mrb[58].mxu1  ;;  %2598 = vmatprep.mubr.bf16.mxu0 %v1323_v47 }
 0x1fe   : > { %v1104_v54 = vadd.f32 %v2525_v52, %v3169_v22  ;;  %v1095_v55 = vpop.f32.mrb[59].mxu1  ;;  %2599 = vmatmul.mubr.bf16.gmra.mrb[52].mxu0 %v1324_v46  ;;  %v1276_v59 = vmax.f32 %v1101_v49, 0.0 }
 0x1ff   : > { %v1096_v57 = vadd.f32 %v3169_v22, %v1095_v55  ;;  %v1274_v62 = vmax.f32 %v1093_v51, 0.0 }
 0x200   : > { %v1277_v60 = vmax.f32 %v1104_v54, 0.0 }
 0x201   : > { %v1275_v63 = vmax.f32 %v1096_v57, 0.0 }
 0x202   : > { %v1326_v0 = vpack.c.bf16 %v1277_v60, %v1276_v59 }
 0x203   : > { %v1325_v1 = vpack.c.bf16 %v1275_v63, %v1274_v62  ;;  %v2528_v2 = vpop.f32.mrb[60].mxu1 }
 0x204   : > { %v1117_v3 = vadd.f32 %v2528_v2, %v3169_v22  ;;  %v1108_v4 = vpop.f32.mrb[61].mxu1 }
 0x205   : > { %v1109_v5 = vadd.f32 %v3169_v22, %v1108_v4  ;;  %v2529_v6 = vpop.f32.mrb[62].mxu1  ;;  %2602 = vmatprep.mubr.bf16.mxu0 %v1325_v1 }
 0x206   : > { %v1120_v7 = vadd.f32 %v2529_v6, %v3169_v22  ;;  %v1111_v8 = vpop.f32.mrb[63].mxu1  ;;  %2603 = vmatmul.mubr.bf16.gmra.mrb[56].mxu0 %v1326_v0  ;;  %v1280_v10 = vmax.f32 %v1117_v3, 0.0 }
 0x207   : > { %v1112_v9 = vadd.f32 %v3169_v22, %v1111_v8  ;;  %v1278_v12 = vmax.f32 %v1109_v5, 0.0 }
 0x208   : > { %v1281_v11 = vmax.f32 %v1120_v7, 0.0 }
 0x209   : > { %v1279_v13 = vmax.f32 %v1112_v9, 0.0 }
 0x20a   : > { %v1328_v14 = vpack.c.bf16 %v1281_v11, %v1280_v10 }
 0x20b   : > { %v1327_v15 = vpack.c.bf16 %v1279_v13, %v1278_v12  ;;  %v2532_v16 = vpop.f32.mrb[64].mxu1 }
 0x20c   : > { %v1133_v17 = vadd.f32 %v2532_v16, %v3169_v22  ;;  %v1124_v18 = vpop.f32.mrb[65].mxu1 }
 0x20d   : > { %v1125_v20 = vadd.f32 %v3169_v22, %v1124_v18  ;;  %v2533_v21 = vpop.f32.mrb[66].mxu1  ;;  %2606 = vmatprep.mubr.bf16.mxu0 %v1327_v15 }
 0x20e   : > { %v1136_v24 = vadd.f32 %v2533_v21, %v3169_v22  ;;  %v1127_v26 = vpop.f32.mrb[67].mxu1  ;;  %2607 = vmatmul.mubr.bf16.gmra.mrb[60].mxu0 %v1328_v14  ;;  %v1284_v29 = vmax.f32 %v1133_v17, 0.0 }
 0x20f   : > { %v1128_v28 = vadd.f32 %v3169_v22, %v1127_v26  ;;  %v1282_v30 = vmax.f32 %v1125_v20, 0.0 }
 0x210   : > { %v1285_v31 = vmax.f32 %v1136_v24, 0.0 }
 0x211   : > { %v1283_v27 = vmax.f32 %v1128_v28, 0.0 }
 0x212   : > { %v1330_v58 = vpack.c.bf16 %v1285_v31, %v1284_v29 }
 0x213   : > { %v1329_v61 = vpack.c.bf16 %v1283_v27, %v1282_v30  ;;  %v2536_v25 = vpop.f32.mrb[68].mxu1 }
 0x214   : > { %v1149_v53 = vadd.f32 %v2536_v25, %v3169_v22  ;;  %v1140_v56 = vpop.f32.mrb[69].mxu1 }
 0x215   : > { %v1141_v19 = vadd.f32 %v3169_v22, %v1140_v56  ;;  %v2537_v23 = vpop.f32.mrb[70].mxu1  ;;  %2610 = vmatprep.mubr.bf16.mxu0 %v1329_v61 }
 0x216   : > { %v1152_v32 = vadd.f32 %v2537_v23, %v3169_v22  ;;  %v1143_v40 = vpop.f32.mrb[71].mxu1  ;;  %2611 = vmatmul.mubr.bf16.gmra.mrb[64].mxu0 %v1330_v58  ;;  %v1288_v34 = vmax.f32 %v1149_v53, 0.0 }
 0x217   : > { %v1144_v33 = vadd.f32 %v3169_v22, %v1143_v40  ;;  %v1286_v36 = vmax.f32 %v1141_v19, 0.0 }
 0x218   : > { %v1289_v35 = vmax.f32 %v1152_v32, 0.0 }
 0x219   : > { %v1287_v37 = vmax.f32 %v1144_v33, 0.0 }
 0x21a   : > { %v1332_v38 = vpack.c.bf16 %v1289_v35, %v1288_v34 }
 0x21b   : > { %v1331_v39 = vpack.c.bf16 %v1287_v37, %v1286_v36  ;;  %v2540_v41 = vpop.f32.mrb[72].mxu1 }
 0x21c   : > { %v1165_v42 = vadd.f32 %v2540_v41, %v3169_v22  ;;  %v1156_v43 = vpop.f32.mrb[73].mxu1 }
 0x21d   : > { %v1157_v44 = vadd.f32 %v3169_v22, %v1156_v43  ;;  %v2541_v45 = vpop.f32.mrb[74].mxu1  ;;  %2614 = vmatprep.mubr.bf16.mxu0 %v1331_v39 }
 0x21e   : > { %v1168_v46 = vadd.f32 %v2541_v45, %v3169_v22  ;;  %v1159_v47 = vpop.f32.mrb[75].mxu1  ;;  %2615 = vmatmul.mubr.bf16.gmra.mrb[68].mxu0 %v1332_v38  ;;  %v1292_v49 = vmax.f32 %v1165_v42, 0.0 }
 0x21f   : > { %v1160_v48 = vadd.f32 %v3169_v22, %v1159_v47  ;;  %v1290_v51 = vmax.f32 %v1157_v44, 0.0 }
 0x220   : > { %v1293_v50 = vmax.f32 %v1168_v46, 0.0 }
 0x221   : > { %v1291_v52 = vmax.f32 %v1160_v48, 0.0 }
 0x222   : > { %v1334_v54 = vpack.c.bf16 %v1293_v50, %v1292_v49 }
 0x223   : > { %v1333_v55 = vpack.c.bf16 %v1291_v52, %v1290_v51  ;;  %v2544_v57 = vpop.f32.mrb[76].mxu1 }
 0x224   : > { %v1181_v59 = vadd.f32 %v2544_v57, %v3169_v22  ;;  %v1172_v60 = vpop.f32.mrb[77].mxu1 }
 0x225   : > { %v1173_v62 = vadd.f32 %v3169_v22, %v1172_v60  ;;  %v2545_v63 = vpop.f32.mrb[78].mxu1  ;;  %2618 = vmatprep.mubr.bf16.mxu0 %v1333_v55 }
 0x226   : > { %v1184_v0 = vadd.f32 %v2545_v63, %v3169_v22  ;;  %v1175_v1 = vpop.f32.mrb[79].mxu1  ;;  %2619 = vmatmul.mubr.bf16.gmra.mrb[72].mxu0 %v1334_v54  ;;  %v1296_v3 = vmax.f32 %v1181_v59, 0.0 }
 0x227   : > { %v1176_v2 = vadd.f32 %v3169_v22, %v1175_v1  ;;  %v1294_v5 = vmax.f32 %v1173_v62, 0.0 }
 0x228   : > { %v1297_v4 = vmax.f32 %v1184_v0, 0.0  ;;  %v3238_v0 = vld [vmem:[%s3636_s6] ss:$0 sm:$0xff] }
 0x229   : > { %v1295_v6 = vmax.f32 %v1176_v2, 0.0 }
 0x22a   : > { %v1336_v7 = vpack.c.bf16 %v1297_v4, %v1296_v3 }
 0x22b   : > { %v1335_v8 = vpack.c.bf16 %v1295_v6, %v1294_v5  ;;  %v2548_v9 = vpop.f32.mrb[80].mxu1 }
 0x22c   : > { %v1197_v10 = vadd.f32 %v2548_v9, %v3169_v22  ;;  %v1188_v11 = vpop.f32.mrb[81].mxu1 }
 0x22d   : > { %v1189_v12 = vadd.f32 %v3169_v22, %v1188_v11  ;;  %v2549_v13 = vpop.f32.mrb[82].mxu1  ;;  %2622 = vmatprep.mubr.bf16.mxu0 %v1335_v8 }
 0x22e   : > { %v1200_v14 = vadd.f32 %v2549_v13, %v3169_v22  ;;  %v1191_v15 = vpop.f32.mrb[83].mxu1  ;;  %2623 = vmatmul.mubr.bf16.gmra.mrb[76].mxu0 %v1336_v7  ;;  %v1300_v17 = vmax.f32 %v1197_v10, 0.0 }
 0x22f   : > { %v1192_v16 = vadd.f32 %v3169_v22, %v1191_v15  ;;  %v1298_v20 = vmax.f32 %v1189_v12, 0.0 }
 0x230   : > { %v1301_v18 = vmax.f32 %v1200_v14, 0.0 }
 0x231   : > { %v1299_v21 = vmax.f32 %v1192_v16, 0.0 }
 0x232   : > { %v1338_v24 = vpack.c.bf16 %v1301_v18, %v1300_v17 }
 0x233   : > { %v1337_v26 = vpack.c.bf16 %v1299_v21, %v1298_v20  ;;  %v2552_v28 = vpop.f32.mrb[84].mxu1 }
 0x234   : > { %v1213_v29 = vadd.f32 %v2552_v28, %v3169_v22  ;;  %v1204_v31 = vpop.f32.mrb[85].mxu1 }
 0x235   : > { %v1205_v30 = vadd.f32 %v3169_v22, %v1204_v31  ;;  %v2553_v27 = vpop.f32.mrb[86].mxu1  ;;  %2626 = vmatprep.mubr.bf16.mxu0 %v1337_v26 }
 0x236   : > { %v1216_v58 = vadd.f32 %v2553_v27, %v3169_v22  ;;  %v1207_v61 = vpop.f32.mrb[87].mxu1  ;;  %2627 = vmatmul.mubr.bf16.gmra.mrb[80].mxu0 %v1338_v24  ;;  %v1304_v53 = vmax.f32 %v1213_v29, 0.0 }
 0x237   : > { %v1208_v25 = vadd.f32 %v3169_v22, %v1207_v61  ;;  %v1302_v19 = vmax.f32 %v1205_v30, 0.0 }
 0x238   : > { %v1305_v56 = vmax.f32 %v1216_v58, 0.0 }
 0x239   : > { %v1303_v23 = vmax.f32 %v1208_v25, 0.0 }
 0x23a   : > { %v1340_v32 = vpack.c.bf16 %v1305_v56, %v1304_v53 }
 0x23b   : > { %v1339_v40 = vpack.c.bf16 %v1303_v23, %v1302_v19  ;;  %v2556_v33 = vpop.f32.mrb[88].mxu1 }
 0x23c   : > { %v1229_v34 = vadd.f32 %v2556_v33, %v3169_v22  ;;  %v1220_v35 = vpop.f32.mrb[89].mxu1 }
 0x23d   : > { %v1221_v36 = vadd.f32 %v3169_v22, %v1220_v35  ;;  %v2557_v37 = vpop.f32.mrb[90].mxu1  ;;  %2630 = vmatprep.mubr.bf16.mxu0 %v1339_v40 }
 0x23e   : > { %v1232_v38 = vadd.f32 %v2557_v37, %v3169_v22  ;;  %v1223_v39 = vpop.f32.mrb[91].mxu1  ;;  %2631 = vmatmul.mubr.bf16.gmra.mrb[84].mxu0 %v1340_v32  ;;  %v1308_v42 = vmax.f32 %v1229_v34, 0.0 }
 0x23f   : > { %v1224_v41 = vadd.f32 %v3169_v22, %v1223_v39  ;;  %v1306_v44 = vmax.f32 %v1221_v36, 0.0 }
 0x240   : > { %v1309_v43 = vmax.f32 %v1232_v38, 0.0 }
 0x241   : > { %v1307_v45 = vmax.f32 %v1224_v41, 0.0 }
 0x242   : > { %v1342_v46 = vpack.c.bf16 %v1309_v43, %v1308_v42 }
 0x243   : > { %v1341_v47 = vpack.c.bf16 %v1307_v45, %v1306_v44  ;;  %v2560_v48 = vpop.f32.mrb[92].mxu1 }
 0x244   : > { %v1245_v49 = vadd.f32 %v2560_v48, %v3169_v22  ;;  %v1236_v50 = vpop.f32.mrb[93].mxu1 }
 0x245   : > { %v1237_v51 = vadd.f32 %v3169_v22, %v1236_v50  ;;  %v2561_v52 = vpop.f32.mrb[94].mxu1  ;;  %2634 = vmatprep.mubr.bf16.mxu0 %v1341_v47 }
 0x246   : > { %v1239_v54 = vpop.f32.mrb[95].mxu1  ;;  %2635 = vmatmul.mubr.bf16.gmra.mrb[88].mxu0 %v1342_v46  ;;  %v1312_v57 = vmax.f32 %v1245_v49, 0.0 }
 0x247   : > { %v1240_v55 = vadd.f32 %v3169_v22, %v1239_v54  ;;  %v1310_v59 = vmax.f32 %v1237_v51, 0.0 }
 0x248   : > { %v1344_v63 = vpack.c.bf16 %v1312_v57, %v1312_v57 }
 0x249   : > { %v1311_v60 = vmax.f32 %v1240_v55, 0.0 }
 0x24b   : > { %v1343_v62 = vpack.c.bf16 %v1311_v60, %v1310_v59 }
 0x24d   : > { %2638 = vmatprep.mubr.bf16.mxu0 %v1343_v62 }
 0x24e   : > { %2639 = vmatmul.mubr.bf16.gmra.mrb[92].mxu0 %v1344_v63 }
 0x2a9   : > { %v2580_v1 = vpop.f32.mrb[32].mxu0 }
 0x2aa   : > { %v1459_v2 = vadd.f32 %v2580_v1, %v3238_v0  ;;  %v1450_v3 = vpop.f32.mrb[33].mxu0 }
 0x2ab   : > { %v1451_v22 = vadd.f32 %v3238_v0, %v1450_v3  ;;  %v2581_v4 = vpop.f32.mrb[34].mxu0 }
 0x2ac   : > { %1707 = vst.msk [vmem:[%s3242_s30 + $0x10] sm:$0xff] %vm1704_vm1, %v1459_v2  ;;  %v1462_v5 = vadd.f32 %v2581_v4, %v3238_v0  ;;  %v1453_v6 = vpop.f32.mrb[35].mxu0 }
 0x2ad   : > { %1705 = vst.msk [vmem:[%s3242_s30] sm:$0xff] %vm1704_vm1, %v1451_v22  ;;  %v1454_v7 = vadd.f32 %v3238_v0, %v1453_v6 }
 0x2ae   : > { %1708 = vst.msk [vmem:[%s3242_s30 + $0x18] sm:$0xff] %vm1704_vm1, %v1462_v5 }
 0x2af   : > { %1706 = vst.msk [vmem:[%s3242_s30 + $0x8] sm:$0xff] %vm1704_vm1, %v1454_v7 }
 0x2b1   : > { %v2584_v8 = vpop.f32.mrb[36].mxu0 }
 0x2b2   : > { %v1475_v9 = vadd.f32 %v2584_v8, %v3238_v0  ;;  %v1466_v10 = vpop.f32.mrb[37].mxu0 }
 0x2b3   : > { %v1467_v11 = vadd.f32 %v3238_v0, %v1466_v10  ;;  %v2585_v12 = vpop.f32.mrb[38].mxu0 }
 0x2b4   : > { %1711 = vst.msk [vmem:[%s3242_s30 + $0x30] sm:$0xff] %vm1704_vm1, %v1475_v9  ;;  %v1478_v13 = vadd.f32 %v2585_v12, %v3238_v0  ;;  %v1469_v14 = vpop.f32.mrb[39].mxu0 }
 0x2b5   : > { %1709 = vst.msk [vmem:[%s3242_s30 + $0x20] sm:$0xff] %vm1704_vm1, %v1467_v11  ;;  %v1470_v15 = vadd.f32 %v3238_v0, %v1469_v14 }
 0x2b6   : > { %1712 = vst.msk [vmem:[%s3242_s30 + $0x38] sm:$0xff] %vm1704_vm1, %v1478_v13 }
 0x2b7   : > { %1710 = vst.msk [vmem:[%s3242_s30 + $0x28] sm:$0xff] %vm1704_vm1, %v1470_v15 }
 0x2b9   : > { %v2588_v16 = vpop.f32.mrb[40].mxu0 }
 0x2ba   : > { %v1491_v17 = vadd.f32 %v2588_v16, %v3238_v0  ;;  %v1482_v18 = vpop.f32.mrb[41].mxu0 }
 0x2bb   : > { %v1483_v20 = vadd.f32 %v3238_v0, %v1482_v18  ;;  %v2589_v21 = vpop.f32.mrb[42].mxu0 }
 0x2bc   : > { %1715 = vst.msk [vmem:[%s3242_s30 + $0x50] sm:$0xff] %vm1704_vm1, %v1491_v17  ;;  %v1494_v24 = vadd.f32 %v2589_v21, %v3238_v0  ;;  %v1485_v26 = vpop.f32.mrb[43].mxu0 }
 0x2bd   : > { %1713 = vst.msk [vmem:[%s3242_s30 + $0x40] sm:$0xff] %vm1704_vm1, %v1483_v20  ;;  %v1486_v28 = vadd.f32 %v3238_v0, %v1485_v26 }
 0x2be   : > { %1716 = vst.msk [vmem:[%s3242_s30 + $0x58] sm:$0xff] %vm1704_vm1, %v1494_v24 }
 0x2bf   : > { %1714 = vst.msk [vmem:[%s3242_s30 + $0x48] sm:$0xff] %vm1704_vm1, %v1486_v28 }
 0x2c1   : > { %v2592_v29 = vpop.f32.mrb[44].mxu0 }
 0x2c2   : > { %v1507_v31 = vadd.f32 %v2592_v29, %v3238_v0  ;;  %v1498_v30 = vpop.f32.mrb[45].mxu0 }
 0x2c3   : > { %v1499_v27 = vadd.f32 %v3238_v0, %v1498_v30  ;;  %v2593_v58 = vpop.f32.mrb[46].mxu0 }
 0x2c4   : > { %1719 = vst.msk [vmem:[%s3242_s30 + $0x70] sm:$0xff] %vm1704_vm1, %v1507_v31  ;;  %v1510_v61 = vadd.f32 %v2593_v58, %v3238_v0  ;;  %v1501_v25 = vpop.f32.mrb[47].mxu0 }
 0x2c5   : > { %1717 = vst.msk [vmem:[%s3242_s30 + $0x60] sm:$0xff] %vm1704_vm1, %v1499_v27  ;;  %v1502_v53 = vadd.f32 %v3238_v0, %v1501_v25 }
 0x2c6   : > { %1720 = vst.msk [vmem:[%s3242_s30 + $0x78] sm:$0xff] %vm1704_vm1, %v1510_v61 }
 0x2c7   : > { %1718 = vst.msk [vmem:[%s3242_s30 + $0x68] sm:$0xff] %vm1704_vm1, %v1502_v53 }
 0x2c9   : > { %v2596_v56 = vpop.f32.mrb[48].mxu0 }
 0x2ca   : > { %v1523_v19 = vadd.f32 %v2596_v56, %v3238_v0  ;;  %v1514_v23 = vpop.f32.mrb[49].mxu0 }
 0x2cb   : > { %v1515_v32 = vadd.f32 %v3238_v0, %v1514_v23  ;;  %v2597_v40 = vpop.f32.mrb[50].mxu0 }
 0x2cc   : > { %1723 = vst.msk [vmem:[%s3242_s30 + $0x90] sm:$0xff] %vm1704_vm1, %v1523_v19  ;;  %v1526_v33 = vadd.f32 %v2597_v40, %v3238_v0  ;;  %v1517_v34 = vpop.f32.mrb[51].mxu0 }
 0x2cd   : > { %1721 = vst.msk [vmem:[%s3242_s30 + $0x80] sm:$0xff] %vm1704_vm1, %v1515_v32  ;;  %v1518_v35 = vadd.f32 %v3238_v0, %v1517_v34 }
 0x2ce   : > { %1724 = vst.msk [vmem:[%s3242_s30 + $0x98] sm:$0xff] %vm1704_vm1, %v1526_v33 }
 0x2cf   : > { %1722 = vst.msk [vmem:[%s3242_s30 + $0x88] sm:$0xff] %vm1704_vm1, %v1518_v35 }
 0x2d1   : > { %v2600_v36 = vpop.f32.mrb[52].mxu0 }
 0x2d2   : > { %v1539_v37 = vadd.f32 %v2600_v36, %v3238_v0  ;;  %v1530_v38 = vpop.f32.mrb[53].mxu0 }
 0x2d3   : > { %v1531_v39 = vadd.f32 %v3238_v0, %v1530_v38  ;;  %v2601_v41 = vpop.f32.mrb[54].mxu0 }
 0x2d4   : > { %1727 = vst.msk [vmem:[%s3242_s30 + $0xb0] sm:$0xff] %vm1704_vm1, %v1539_v37  ;;  %v1542_v42 = vadd.f32 %v2601_v41, %v3238_v0  ;;  %v1533_v43 = vpop.f32.mrb[55].mxu0 }
 0x2d5   : > { %1725 = vst.msk [vmem:[%s3242_s30 + $0xa0] sm:$0xff] %vm1704_vm1, %v1531_v39  ;;  %v1534_v44 = vadd.f32 %v3238_v0, %v1533_v43 }
 0x2d6   : > { %1728 = vst.msk [vmem:[%s3242_s30 + $0xb8] sm:$0xff] %vm1704_vm1, %v1542_v42 }
 0x2d7   : > { %1726 = vst.msk [vmem:[%s3242_s30 + $0xa8] sm:$0xff] %vm1704_vm1, %v1534_v44 }
 0x2d9   : > { %v2604_v45 = vpop.f32.mrb[56].mxu0 }
 0x2da   : > { %v1555_v46 = vadd.f32 %v2604_v45, %v3238_v0  ;;  %v1546_v47 = vpop.f32.mrb[57].mxu0 }
 0x2db   : > { %v1547_v48 = vadd.f32 %v3238_v0, %v1546_v47  ;;  %v2605_v49 = vpop.f32.mrb[58].mxu0 }
 0x2dc   : > { %1731 = vst.msk [vmem:[%s3242_s30 + $0xd0] sm:$0xff] %vm1704_vm1, %v1555_v46  ;;  %v1558_v50 = vadd.f32 %v2605_v49, %v3238_v0  ;;  %v1549_v51 = vpop.f32.mrb[59].mxu0 }
 0x2dd   : > { %1729 = vst.msk [vmem:[%s3242_s30 + $0xc0] sm:$0xff] %vm1704_vm1, %v1547_v48  ;;  %v1550_v52 = vadd.f32 %v3238_v0, %v1549_v51 }
 0x2de   : > { %1732 = vst.msk [vmem:[%s3242_s30 + $0xd8] sm:$0xff] %vm1704_vm1, %v1558_v50 }
 0x2df   : > { %1730 = vst.msk [vmem:[%s3242_s30 + $0xc8] sm:$0xff] %vm1704_vm1, %v1550_v52 }
 0x2e1   : > { %v2608_v54 = vpop.f32.mrb[60].mxu0 }
 0x2e2   : > { %v1571_v55 = vadd.f32 %v2608_v54, %v3238_v0  ;;  %v1562_v57 = vpop.f32.mrb[61].mxu0 }
 0x2e3   : > { %v1563_v59 = vadd.f32 %v3238_v0, %v1562_v57  ;;  %v2609_v60 = vpop.f32.mrb[62].mxu0 }
 0x2e4   : > { %1735 = vst.msk [vmem:[%s3242_s30 + $0xf0] sm:$0xff] %vm1704_vm1, %v1571_v55  ;;  %v1574_v62 = vadd.f32 %v2609_v60, %v3238_v0  ;;  %v1565_v63 = vpop.f32.mrb[63].mxu0 }
 0x2e5   : > { %1733 = vst.msk [vmem:[%s3242_s30 + $0xe0] sm:$0xff] %vm1704_vm1, %v1563_v59  ;;  %v1566_v1 = vadd.f32 %v3238_v0, %v1565_v63 }
 0x2e6   : > { %1736 = vst.msk [vmem:[%s3242_s30 + $0xf8] sm:$0xff] %vm1704_vm1, %v1574_v62 }
 0x2e7   : > { %1734 = vst.msk [vmem:[%s3242_s30 + $0xe8] sm:$0xff] %vm1704_vm1, %v1566_v1 }
 0x2e9   : > { %v2612_v2 = vpop.f32.mrb[64].mxu0 }
 0x2ea   : > { %v1587_v3 = vadd.f32 %v2612_v2, %v3238_v0  ;;  %v1578_v22 = vpop.f32.mrb[65].mxu0 }
 0x2eb   : > { %v1579_v4 = vadd.f32 %v3238_v0, %v1578_v22  ;;  %v2613_v5 = vpop.f32.mrb[66].mxu0 }
 0x2ec   : > { %1739 = vst.msk [vmem:[%s3242_s30 + $0x110] sm:$0xff] %vm1704_vm1, %v1587_v3  ;;  %v1590_v6 = vadd.f32 %v2613_v5, %v3238_v0  ;;  %v1581_v7 = vpop.f32.mrb[67].mxu0 }
 0x2ed   : > { %1737 = vst.msk [vmem:[%s3242_s30 + $0x100] sm:$0xff] %vm1704_vm1, %v1579_v4  ;;  %v1582_v8 = vadd.f32 %v3238_v0, %v1581_v7 }
 0x2ee   : > { %1740 = vst.msk [vmem:[%s3242_s30 + $0x118] sm:$0xff] %vm1704_vm1, %v1590_v6 }
 0x2ef   : > { %1738 = vst.msk [vmem:[%s3242_s30 + $0x108] sm:$0xff] %vm1704_vm1, %v1582_v8 }
 0x2f1   : > { %v2616_v9 = vpop.f32.mrb[68].mxu0 }
 0x2f2   : > { %v1603_v10 = vadd.f32 %v2616_v9, %v3238_v0  ;;  %v1594_v11 = vpop.f32.mrb[69].mxu0 }
 0x2f3   : > { %v1595_v12 = vadd.f32 %v3238_v0, %v1594_v11  ;;  %v2617_v13 = vpop.f32.mrb[70].mxu0 }
 0x2f4   : > { %1743 = vst.msk [vmem:[%s3242_s30 + $0x130] sm:$0xff] %vm1704_vm1, %v1603_v10  ;;  %v1606_v14 = vadd.f32 %v2617_v13, %v3238_v0  ;;  %v1597_v15 = vpop.f32.mrb[71].mxu0 }
 0x2f5   : > { %1741 = vst.msk [vmem:[%s3242_s30 + $0x120] sm:$0xff] %vm1704_vm1, %v1595_v12  ;;  %v1598_v16 = vadd.f32 %v3238_v0, %v1597_v15 }
 0x2f6   : > { %1744 = vst.msk [vmem:[%s3242_s30 + $0x138] sm:$0xff] %vm1704_vm1, %v1606_v14 }
 0x2f7   : > { %1742 = vst.msk [vmem:[%s3242_s30 + $0x128] sm:$0xff] %vm1704_vm1, %v1598_v16 }
 0x2f9   : > { %v2620_v17 = vpop.f32.mrb[72].mxu0 }
 0x2fa   : > { %v1619_v18 = vadd.f32 %v2620_v17, %v3238_v0  ;;  %v1610_v20 = vpop.f32.mrb[73].mxu0 }
 0x2fb   : > { %v1611_v21 = vadd.f32 %v3238_v0, %v1610_v20  ;;  %v2621_v24 = vpop.f32.mrb[74].mxu0 }
 0x2fc   : > { %1747 = vst.msk [vmem:[%s3242_s30 + $0x150] sm:$0xff] %vm1704_vm1, %v1619_v18  ;;  %v1622_v26 = vadd.f32 %v2621_v24, %v3238_v0  ;;  %v1613_v28 = vpop.f32.mrb[75].mxu0 }
 0x2fd   : > { %1745 = vst.msk [vmem:[%s3242_s30 + $0x140] sm:$0xff] %vm1704_vm1, %v1611_v21  ;;  %v1614_v29 = vadd.f32 %v3238_v0, %v1613_v28 }
 0x2fe   : > { %1748 = vst.msk [vmem:[%s3242_s30 + $0x158] sm:$0xff] %vm1704_vm1, %v1622_v26 }
 0x2ff   : > { %1746 = vst.msk [vmem:[%s3242_s30 + $0x148] sm:$0xff] %vm1704_vm1, %v1614_v29 }
 0x301   : > { %v2624_v31 = vpop.f32.mrb[76].mxu0 }
 0x302   : > { %v1635_v30 = vadd.f32 %v2624_v31, %v3238_v0  ;;  %v1626_v27 = vpop.f32.mrb[77].mxu0 }
 0x303   : > { %v1627_v58 = vadd.f32 %v3238_v0, %v1626_v27  ;;  %v2625_v61 = vpop.f32.mrb[78].mxu0 }
 0x304   : > { %1751 = vst.msk [vmem:[%s3242_s30 + $0x170] sm:$0xff] %vm1704_vm1, %v1635_v30  ;;  %v1638_v25 = vadd.f32 %v2625_v61, %v3238_v0  ;;  %v1629_v53 = vpop.f32.mrb[79].mxu0 }
 0x305   : > { %1749 = vst.msk [vmem:[%s3242_s30 + $0x160] sm:$0xff] %vm1704_vm1, %v1627_v58  ;;  %v1630_v56 = vadd.f32 %v3238_v0, %v1629_v53 }
 0x306   : > { %1752 = vst.msk [vmem:[%s3242_s30 + $0x178] sm:$0xff] %vm1704_vm1, %v1638_v25 }
 0x307   : > { %1750 = vst.msk [vmem:[%s3242_s30 + $0x168] sm:$0xff] %vm1704_vm1, %v1630_v56 }
 0x309   : > { %v2628_v19 = vpop.f32.mrb[80].mxu0 }
 0x30a   : > { %v1651_v23 = vadd.f32 %v2628_v19, %v3238_v0  ;;  %v1642_v32 = vpop.f32.mrb[81].mxu0 }
 0x30b   : > { %v1643_v40 = vadd.f32 %v3238_v0, %v1642_v32  ;;  %v2629_v33 = vpop.f32.mrb[82].mxu0 }
 0x30c   : > { %1755 = vst.msk [vmem:[%s3242_s30 + $0x190] sm:$0xff] %vm1704_vm1, %v1651_v23  ;;  %v1654_v34 = vadd.f32 %v2629_v33, %v3238_v0  ;;  %v1645_v35 = vpop.f32.mrb[83].mxu0 }
 0x30d   : > { %1753 = vst.msk [vmem:[%s3242_s30 + $0x180] sm:$0xff] %vm1704_vm1, %v1643_v40  ;;  %v1646_v36 = vadd.f32 %v3238_v0, %v1645_v35 }
 0x30e   : > { %1756 = vst.msk [vmem:[%s3242_s30 + $0x198] sm:$0xff] %vm1704_vm1, %v1654_v34 }
 0x30f   : > { %1754 = vst.msk [vmem:[%s3242_s30 + $0x188] sm:$0xff] %vm1704_vm1, %v1646_v36 }
 0x311   : > { %v2632_v37 = vpop.f32.mrb[84].mxu0 }
 0x312   : > { %v1667_v38 = vadd.f32 %v2632_v37, %v3238_v0  ;;  %v1658_v39 = vpop.f32.mrb[85].mxu0 }
 0x313   : > { %v1659_v41 = vadd.f32 %v3238_v0, %v1658_v39  ;;  %v2633_v42 = vpop.f32.mrb[86].mxu0 }
 0x314   : > { %1759 = vst.msk [vmem:[%s3242_s30 + $0x1b0] sm:$0xff] %vm1704_vm1, %v1667_v38  ;;  %v1670_v43 = vadd.f32 %v2633_v42, %v3238_v0  ;;  %v1661_v44 = vpop.f32.mrb[87].mxu0 }
 0x315   : > { %1757 = vst.msk [vmem:[%s3242_s30 + $0x1a0] sm:$0xff] %vm1704_vm1, %v1659_v41  ;;  %v1662_v45 = vadd.f32 %v3238_v0, %v1661_v44 }
 0x316   : > { %1760 = vst.msk [vmem:[%s3242_s30 + $0x1b8] sm:$0xff] %vm1704_vm1, %v1670_v43 }
 0x317   : > { %1758 = vst.msk [vmem:[%s3242_s30 + $0x1a8] sm:$0xff] %vm1704_vm1, %v1662_v45 }
 0x319   : > { %v2636_v46 = vpop.f32.mrb[88].mxu0 }
 0x31a   : > { %v1683_v47 = vadd.f32 %v2636_v46, %v3238_v0  ;;  %v1674_v48 = vpop.f32.mrb[89].mxu0 }
 0x31b   : > { %v1675_v49 = vadd.f32 %v3238_v0, %v1674_v48  ;;  %v2637_v50 = vpop.f32.mrb[90].mxu0 }
 0x31c   : > { %1763 = vst.msk [vmem:[%s3242_s30 + $0x1d0] sm:$0xff] %vm1704_vm1, %v1683_v47  ;;  %v1686_v51 = vadd.f32 %v2637_v50, %v3238_v0  ;;  %v1677_v52 = vpop.f32.mrb[91].mxu0 }
 0x31d   : > { %1761 = vst.msk [vmem:[%s3242_s30 + $0x1c0] sm:$0xff] %vm1704_vm1, %v1675_v49  ;;  %v1678_v54 = vadd.f32 %v3238_v0, %v1677_v52 }
 0x31e   : > { %1764 = vst.msk [vmem:[%s3242_s30 + $0x1d8] sm:$0xff] %vm1704_vm1, %v1686_v51 }
 0x31f   : > { %1762 = vst.msk [vmem:[%s3242_s30 + $0x1c8] sm:$0xff] %vm1704_vm1, %v1678_v54 }
 0x321   : > { %v2640_v55 = vpop.f32.mrb[92].mxu0  ;;  %1774 = sbr.rel (!%p2908_p4) target bundleno = 892 (0x37c), region = 52 }
 0x322   : > { %v1699_v57 = vadd.f32 %v2640_v55, %v3238_v0  ;;  %v1690_v59 = vpop.f32.mrb[93].mxu0 }
 0x323   : > { %v1691_v60 = vadd.f32 %v3238_v0, %v1690_v59  ;;  %v2641_v62 = vpop.f32.mrb[94].mxu0 }
 0x324   : > { %1767 = vst.msk [vmem:[%s3242_s30 + $0x1f0] sm:$0xff] %vm1704_vm1, %v1699_v57  ;;  %v1693_v63 = vpop.f32.mrb[95].mxu0 }
 0x325   : > { %1765 = vst.msk [vmem:[%s3242_s30 + $0x1e0] sm:$0xff] %vm1704_vm1, %v1691_v60  ;;  %v1694_v1 = vadd.f32 %v3238_v0, %v1693_v63 }
 0x327   : > { %1766 = vst.msk [vmem:[%s3242_s30 + $0x1e8] sm:$0xff] %vm1704_vm1, %v1694_v1 }
 0x328   : > { %s3648_s24 = smov (!%p1777_p8, %s1776_s24), 63 }
 0x329   : > { %s2290_s15 = sshll.u32 %s3648_s24, 7 }
 0x32a   : > { %p2293_p9 = scmp.eq.s32.totalorder %s2290_s15, 0 }
 0x32b   : > { %2751 = sdivrem.u32 (!%p2293_p9), %s3648_s24, 63 }
 0x32c   : > { %1785 = sbr.rel (%p2293_p9) target bundleno = 892 (0x37c), region = 56 }
 0x334   : > { %s3444_s9 = spop.drf %2751 }
 0x335   : > { %p2294_p10 = scmp.le.s32.totalorder %s3444_s9, 0 }
 0x336   : > { %s3639_s27 = smov (!%p2294_p10), %s3438_s14  ;;  %s3640_s12 = smov (!%p2294_p10), %s3242_s30 }
 0x337   : > { %2189 = sbr.rel (%p2294_p10) target bundleno = 863 (0x35f), region = 132  ;;  %s3453_s16 = smov (!%p2294_p10), 0  }
 0x338   : > { %s3455_s17 = smov (!%p2294_p10), 0  }
 0x33e LB: >> { %v1973_v0 = vld [vmem:[%s2817_s12] sm:$0xff]  ;;  %v1975_v2 = vld [vmem:[%s2817_s12 + $0x8] sm:$0xff]  ;;  %v1977_v3 = vld [vmem:[%s2817_s12 + $0x10] sm:$0xff]  ;;  %s2099_s18 = sadd.s32 1, %s2821_s16  ;;  %s1967_s17 = sadd.s32 1, %s2825_s17   ;;  %s2825_s17 = sphi %s3455_s17, %s1967_s17   ;;  %s2821_s16 = sphi %s3453_s16, %s3643_s16   ;;  %s2817_s12 = sphi %s3640_s12, %s3642_s12   ;;  %s2813_s27 = sphi %s3639_s27, %s3641_s27  }
 0x33f   : >> { %1974 = vst [vmem:[%s2813_s27] sm:$0xff] %v1973_v0  ;;  %1976 = vst [vmem:[%s2813_s27 + $0x8] sm:$0xff] %v1975_v2  ;;  %v1979_v22 = vld [vmem:[%s2817_s12 + $0x18] sm:$0xff]  ;;  %v1981_v4 = vld [vmem:[%s2817_s12 + $0x20] sm:$0xff]  ;;  %p2100_p11 = scmp.ge.s32.totalorder %s2099_s18, %s3444_s9  ;;  %p1966_p12 = scmp.ge.s32.totalorder %s1967_s17, %s3444_s9 }
 0x340   : >> { %1978 = vst [vmem:[%s2813_s27 + $0x10] sm:$0xff] %v1977_v3  ;;  %v1983_v5 = vld [vmem:[%s2817_s12 + $0x28] sm:$0xff]  ;;  %1980 = vst [vmem:[%s2813_s27 + $0x18] sm:$0xff] %v1979_v22  ;;  %v1985_v6 = vld [vmem:[%s2817_s12 + $0x30] sm:$0xff] }
 0x341   : >> { %1982 = vst [vmem:[%s2813_s27 + $0x20] sm:$0xff] %v1981_v4  ;;  %1984 = vst [vmem:[%s2813_s27 + $0x28] sm:$0xff] %v1983_v5  ;;  %v1987_v7 = vld [vmem:[%s2817_s12 + $0x38] sm:$0xff]  ;;  %v1989_v8 = vld [vmem:[%s2817_s12 + $0x40] sm:$0xff]  ;;  %s3650_s18 = smov (%p2100_p11, %s2099_s18), 0 }
 0x342   : >> { %1986 = vst [vmem:[%s2813_s27 + $0x30] sm:$0xff] %v1985_v6  ;;  %1988 = vst [vmem:[%s2813_s27 + $0x38] sm:$0xff] %v1987_v7  ;;  %v1991_v9 = vld [vmem:[%s2817_s12 + $0x48] sm:$0xff]  ;;  %v1993_v10 = vld [vmem:[%s2817_s12 + $0x50] sm:$0xff]  ;;  %s2102_s20 = smul.u32 504, %s3650_s18  ;;  %s3643_s16 = smov %s3650_s18 }
 0x343   : >> { %1990 = vst [vmem:[%s2813_s27 + $0x40] sm:$0xff] %v1989_v8  ;;  %v1995_v11 = vld [vmem:[%s2817_s12 + $0x58] sm:$0xff]  ;;  %1992 = vst [vmem:[%s2813_s27 + $0x48] sm:$0xff] %v1991_v9  ;;  %v1997_v12 = vld [vmem:[%s2817_s12 + $0x60] sm:$0xff] }
 0x344   : >> { %1994 = vst [vmem:[%s2813_s27 + $0x50] sm:$0xff] %v1993_v10  ;;  %1996 = vst [vmem:[%s2813_s27 + $0x58] sm:$0xff] %v1995_v11  ;;  %v1999_v13 = vld [vmem:[%s2817_s12 + $0x68] sm:$0xff]  ;;  %v2001_v14 = vld [vmem:[%s2817_s12 + $0x70] sm:$0xff]  ;;  %s3517_s19 = scalar_lea.vmem %s3242_s30, %s2102_s20 [#allocation2]   ;;  %s3520_s21 = scalar_lea.vmem %s3438_s14, %s2102_s20  }
 0x345   : >> { %1998 = vst [vmem:[%s2813_s27 + $0x60] sm:$0xff] %v1997_v12  ;;  %2000 = vst [vmem:[%s2813_s27 + $0x68] sm:$0xff] %v1999_v13  ;;  %v2003_v15 = vld [vmem:[%s2817_s12 + $0x78] sm:$0xff]  ;;  %v2005_v16 = vld [vmem:[%s2817_s12 + $0x80] sm:$0xff] }
 0x346   : >> { %2002 = vst [vmem:[%s2813_s27 + $0x70] sm:$0xff] %v2001_v14  ;;  %v2007_v17 = vld [vmem:[%s2817_s12 + $0x88] sm:$0xff]  ;;  %2004 = vst [vmem:[%s2813_s27 + $0x78] sm:$0xff] %v2003_v15  ;;  %v2009_v18 = vld [vmem:[%s2817_s12 + $0x90] sm:$0xff] }
 0x347   : >> { %2006 = vst [vmem:[%s2813_s27 + $0x80] sm:$0xff] %v2005_v16  ;;  %2008 = vst [vmem:[%s2813_s27 + $0x88] sm:$0xff] %v2007_v17  ;;  %v2011_v20 = vld [vmem:[%s2817_s12 + $0x98] sm:$0xff]  ;;  %v2013_v21 = vld [vmem:[%s2817_s12 + $0xa0] sm:$0xff] }
 0x348   : >> { %2010 = vst [vmem:[%s2813_s27 + $0x90] sm:$0xff] %v2009_v18  ;;  %2012 = vst [vmem:[%s2813_s27 + $0x98] sm:$0xff] %v2011_v20  ;;  %v2015_v24 = vld [vmem:[%s2817_s12 + $0xa8] sm:$0xff]  ;;  %v2017_v26 = vld [vmem:[%s2817_s12 + $0xb0] sm:$0xff] }
 0x349   : >> { %2014 = vst [vmem:[%s2813_s27 + $0xa0] sm:$0xff] %v2013_v21  ;;  %v2019_v28 = vld [vmem:[%s2817_s12 + $0xb8] sm:$0xff]  ;;  %2016 = vst [vmem:[%s2813_s27 + $0xa8] sm:$0xff] %v2015_v24  ;;  %v2021_v29 = vld [vmem:[%s2817_s12 + $0xc0] sm:$0xff] }
 0x34a   : >> { %2018 = vst [vmem:[%s2813_s27 + $0xb0] sm:$0xff] %v2017_v26  ;;  %2020 = vst [vmem:[%s2813_s27 + $0xb8] sm:$0xff] %v2019_v28  ;;  %v2023_v31 = vld [vmem:[%s2817_s12 + $0xc8] sm:$0xff]  ;;  %v2025_v30 = vld [vmem:[%s2817_s12 + $0xd0] sm:$0xff] }
 0x34b   : >> { %2022 = vst [vmem:[%s2813_s27 + $0xc0] sm:$0xff] %v2021_v29  ;;  %2024 = vst [vmem:[%s2813_s27 + $0xc8] sm:$0xff] %v2023_v31  ;;  %v2027_v27 = vld [vmem:[%s2817_s12 + $0xd8] sm:$0xff]  ;;  %v2029_v58 = vld [vmem:[%s2817_s12 + $0xe0] sm:$0xff] }
 0x34c   : >> { %2026 = vst [vmem:[%s2813_s27 + $0xd0] sm:$0xff] %v2025_v30  ;;  %v2031_v61 = vld [vmem:[%s2817_s12 + $0xe8] sm:$0xff]  ;;  %2028 = vst [vmem:[%s2813_s27 + $0xd8] sm:$0xff] %v2027_v27  ;;  %v2033_v25 = vld [vmem:[%s2817_s12 + $0xf0] sm:$0xff] }
 0x34d   : >> { %2030 = vst [vmem:[%s2813_s27 + $0xe0] sm:$0xff] %v2029_v58  ;;  %2032 = vst [vmem:[%s2813_s27 + $0xe8] sm:$0xff] %v2031_v61  ;;  %v2035_v53 = vld [vmem:[%s2817_s12 + $0xf8] sm:$0xff]  ;;  %v2037_v56 = vld [vmem:[%s2817_s12 + $0x100] sm:$0xff] }
 0x34e   : >> { %2034 = vst [vmem:[%s2813_s27 + $0xf0] sm:$0xff] %v2033_v25  ;;  %2036 = vst [vmem:[%s2813_s27 + $0xf8] sm:$0xff] %v2035_v53  ;;  %v2039_v19 = vld [vmem:[%s2817_s12 + $0x108] sm:$0xff]  ;;  %v2041_v23 = vld [vmem:[%s2817_s12 + $0x110] sm:$0xff] }
 0x34f   : >> { %2038 = vst [vmem:[%s2813_s27 + $0x100] sm:$0xff] %v2037_v56  ;;  %v2043_v32 = vld [vmem:[%s2817_s12 + $0x118] sm:$0xff]  ;;  %2040 = vst [vmem:[%s2813_s27 + $0x108] sm:$0xff] %v2039_v19  ;;  %v2045_v40 = vld [vmem:[%s2817_s12 + $0x120] sm:$0xff] }
 0x350   : >> { %2042 = vst [vmem:[%s2813_s27 + $0x110] sm:$0xff] %v2041_v23  ;;  %2044 = vst [vmem:[%s2813_s27 + $0x118] sm:$0xff] %v2043_v32  ;;  %v2047_v33 = vld [vmem:[%s2817_s12 + $0x128] sm:$0xff]  ;;  %v2049_v34 = vld [vmem:[%s2817_s12 + $0x130] sm:$0xff] }
 0x351   : >> { %2046 = vst [vmem:[%s2813_s27 + $0x120] sm:$0xff] %v2045_v40  ;;  %2048 = vst [vmem:[%s2813_s27 + $0x128] sm:$0xff] %v2047_v33  ;;  %v2051_v35 = vld [vmem:[%s2817_s12 + $0x138] sm:$0xff]  ;;  %v2053_v36 = vld [vmem:[%s2817_s12 + $0x140] sm:$0xff] }
 0x352   : >> { %2050 = vst [vmem:[%s2813_s27 + $0x130] sm:$0xff] %v2049_v34  ;;  %v2055_v37 = vld [vmem:[%s2817_s12 + $0x148] sm:$0xff]  ;;  %2052 = vst [vmem:[%s2813_s27 + $0x138] sm:$0xff] %v2051_v35  ;;  %v2057_v38 = vld [vmem:[%s2817_s12 + $0x150] sm:$0xff] }
 0x353   : >> { %2054 = vst [vmem:[%s2813_s27 + $0x140] sm:$0xff] %v2053_v36  ;;  %2056 = vst [vmem:[%s2813_s27 + $0x148] sm:$0xff] %v2055_v37  ;;  %v2059_v39 = vld [vmem:[%s2817_s12 + $0x158] sm:$0xff]  ;;  %v2061_v41 = vld [vmem:[%s2817_s12 + $0x160] sm:$0xff] }
 0x354   : >> { %2058 = vst [vmem:[%s2813_s27 + $0x150] sm:$0xff] %v2057_v38  ;;  %2060 = vst [vmem:[%s2813_s27 + $0x158] sm:$0xff] %v2059_v39  ;;  %v2063_v42 = vld [vmem:[%s2817_s12 + $0x168] sm:$0xff]  ;;  %v2065_v43 = vld [vmem:[%s2817_s12 + $0x170] sm:$0xff] }
 0x355   : >> { %2062 = vst [vmem:[%s2813_s27 + $0x160] sm:$0xff] %v2061_v41  ;;  %v2067_v44 = vld [vmem:[%s2817_s12 + $0x178] sm:$0xff]  ;;  %2064 = vst [vmem:[%s2813_s27 + $0x168] sm:$0xff] %v2063_v42  ;;  %v2069_v45 = vld [vmem:[%s2817_s12 + $0x180] sm:$0xff] }
 0x356   : >> { %2066 = vst [vmem:[%s2813_s27 + $0x170] sm:$0xff] %v2065_v43  ;;  %2068 = vst [vmem:[%s2813_s27 + $0x178] sm:$0xff] %v2067_v44  ;;  %v2071_v46 = vld [vmem:[%s2817_s12 + $0x188] sm:$0xff]  ;;  %v2073_v47 = vld [vmem:[%s2817_s12 + $0x190] sm:$0xff] }
 0x357   : >> { %2070 = vst [vmem:[%s2813_s27 + $0x180] sm:$0xff] %v2069_v45  ;;  %2072 = vst [vmem:[%s2813_s27 + $0x188] sm:$0xff] %v2071_v46  ;;  %v2075_v48 = vld [vmem:[%s2817_s12 + $0x198] sm:$0xff]  ;;  %v2077_v49 = vld [vmem:[%s2817_s12 + $0x1a0] sm:$0xff] }
 0x358   : >> { %2074 = vst [vmem:[%s2813_s27 + $0x190] sm:$0xff] %v2073_v47  ;;  %v2079_v50 = vld [vmem:[%s2817_s12 + $0x1a8] sm:$0xff]  ;;  %2076 = vst [vmem:[%s2813_s27 + $0x198] sm:$0xff] %v2075_v48  ;;  %v2081_v51 = vld [vmem:[%s2817_s12 + $0x1b0] sm:$0xff]  ;;  %1969 = sbr.rel (!%p1966_p12) target bundleno = 830 (0x33e), region = 138 }
 0x359   : >> { %2078 = vst [vmem:[%s2813_s27 + $0x1a0] sm:$0xff] %v2077_v49  ;;  %2080 = vst [vmem:[%s2813_s27 + $0x1a8] sm:$0xff] %v2079_v50  ;;  %v2083_v52 = vld [vmem:[%s2817_s12 + $0x1b8] sm:$0xff]  ;;  %v2085_v54 = vld [vmem:[%s2817_s12 + $0x1c0] sm:$0xff] }
 0x35a   : >> { %2082 = vst [vmem:[%s2813_s27 + $0x1b0] sm:$0xff] %v2081_v51  ;;  %2084 = vst [vmem:[%s2813_s27 + $0x1b8] sm:$0xff] %v2083_v52  ;;  %v2087_v55 = vld [vmem:[%s2817_s12 + $0x1c8] sm:$0xff]  ;;  %v2089_v57 = vld [vmem:[%s2817_s12 + $0x1d0] sm:$0xff] }
 0x35b   : >> { %2086 = vst [vmem:[%s2813_s27 + $0x1c0] sm:$0xff] %v2085_v54  ;;  %v2091_v59 = vld [vmem:[%s2817_s12 + $0x1d8] sm:$0xff]  ;;  %2088 = vst [vmem:[%s2813_s27 + $0x1c8] sm:$0xff] %v2087_v55  ;;  %v2093_v60 = vld [vmem:[%s2817_s12 + $0x1e0] sm:$0xff] }
 0x35c   : >> { %2090 = vst [vmem:[%s2813_s27 + $0x1d0] sm:$0xff] %v2089_v57  ;;  %2092 = vst [vmem:[%s2813_s27 + $0x1d8] sm:$0xff] %v2091_v59  ;;  %v2095_v62 = vld [vmem:[%s2817_s12 + $0x1e8] sm:$0xff]  ;;  %v2097_v63 = vld [vmem:[%s2817_s12 + $0x1f0] sm:$0xff]  ;;  %s3642_s12 = smov %s3517_s19 }
 0x35d   : >> { %2094 = vst [vmem:[%s2813_s27 + $0x1e0] sm:$0xff] %v2093_v60  ;;  %2096 = vst [vmem:[%s2813_s27 + $0x1e8] sm:$0xff] %v2095_v62 }
 0x35e   : >> { %2098 = vst [vmem:[%s2813_s27 + $0x1f0] sm:$0xff] %v2097_v63  ;;  %s3641_s27 = smov %s3520_s21 }
 0x35f PF: > { %2753 = sdivrem.u32 %s3648_s24, 63 }
 0x360   : > { %s2295_s22 = smul.u32 504, %s3444_s9 }
 0x362   : > { %s2110_s23 = scalar_lea.vmem %s3242_s30, %s2295_s22 [#allocation2]   ;;  %s2112_s26 = scalar_lea.vmem %s3438_s14, %s2295_s22  }
 0x368   : > { %s2754_s29 = spop.drf %2753 }
 0x369   : > { %p2297_p13 = scmp.le.s32.totalorder %s2754_s29, 0 }
 0x36a   : > { %s2827_s10 = smov (!%p2297_p13), %s2112_s26   ;;  %s2831_s11 = smov (!%p2297_p13), %s2110_s23  }
 0x36b   : > { %2203 = sbr.rel (%p2297_p13) target bundleno = 892 (0x37c), region = 143  ;;  %s2835_s13 = smov (!%p2297_p13), 0  }
 0x36c   : > { %s2839_s15 = smov (!%p2297_p13), 0  }
 0x372 LB: >> { %v2122_v1 = vld [vmem:[%s2833_s11] sm:$0xff]  ;;  %s2124_s27 = sadd.s32 1, %s2837_s13  ;;  %s2116_s15 = sadd.s32 1, %s2841_s15   ;;  %s2841_s15 = sphi %s2839_s15, %s2116_s15   ;;  %s2837_s13 = sphi %s2835_s13, %s2836_s13   ;;  %s2833_s11 = sphi %s2831_s11, %s2129_s11   ;;  %s2829_s10 = sphi %s2827_s10, %s2130_s10  }
 0x373   : >> { %2123 = vst [vmem:[%s2829_s10] sm:$0xff] %v2122_v1  ;;  %p2125_p0 = scmp.ge.s32.totalorder %s2124_s27, %s2754_s29  ;;  %p2115_p1 = scmp.ge.s32.totalorder %s2116_s15, %s2754_s29 }
 0x375   : >> { %s3652_s27 = smov (%p2125_p0, %s2124_s27), 0  ;;  %2118 = sbr.rel (!%p2115_p1) target bundleno = 882 (0x372), region = 149 }
 0x376   : >> { %s2298_s30 = sshll.u32 %s3652_s27, 3  ;;  %s2836_s13 = smov %s3652_s27  }
 0x377   : >> { %s2129_s11 = scalar_lea.vmem %s2110_s23, %s2298_s30 [#allocation2]   ;;  %s2130_s10 = scalar_lea.vmem %s2112_s26, %s2298_s30  }
 0x37c PF: > { %p14_p2 = scmp.ge.s32.totalorder %s2898_s28, 4   ;;  %s3644_s24 = smov %s2805_s25 }
 0x37d   : > { %s3645_s25 = smov %s2906_s8  ;;  %s3646_s26 = smov %s2898_s28 }
 0x37e   :  { %16 = sbr.rel (!%p14_p2) target bundleno = 2 (0x2), region = 160 }

</bundles_post_ra>
